<compile_context>
chip_gen: v6e
topology: v6e:2x2x1
jax: 0.10.0
libtpu: 0.0.40
codegen_flags: <defaults>
</compile_context>

<pallas_src>
import functools

import jax
import jax.numpy as jnp
from jax.experimental import pallas as pl
from jax.experimental.pallas import tpu as pltpu

# ---------------- small synthetic config (phobert-base stand-in) ----------------
HIDDEN = 32
N_HEADS = 2
HEAD_DIM = HIDDEN // N_HEADS
INTERMEDIATE = 64
N_LAYERS = 2
VOCAB = 100
MAX_POS = 16
N_CLASSES = 3
LN_EPS = 1e-12
DROPOUT_P = 0.3
LOGIT_PAD = 128          # lane-dense classifier output width (real logits = first N_CLASSES)

_VMEM = pltpu.MemorySpace.VMEM
_SMEM = pltpu.MemorySpace.SMEM


def _layernorm(x, g, b):
    mu = jnp.mean(x, axis=-1, keepdims=True)
    var = jnp.mean(jnp.square(x - mu), axis=-1, keepdims=True)
    return (x - mu) * jax.lax.rsqrt(var + LN_EPS) * g + b


def _mxu_dot(a, w_bf16):
    # activation cast to bf16 at the MXU boundary; weights are pre-cast in the wrapper;
    # f32 accumulation. Elementwise math around it stays f32.
    return jnp.dot(a.astype(jnp.bfloat16), w_bf16, preferred_element_type=jnp.float32)


# ------------------------------- fused forward kernel -------------------------------
def fused_forward_kernel(emb_ref, bias_ref, head_vec_ref,
                         wqkvo_ref, w1_ref, w2_ref, vec_ref, b1_ref,
                         head_w_ref, fc_b_ref, seed_ref,
                         o_ref, *, training):
    B, S, H = emb_ref.shape
    scale = 1.0 / (HEAD_DIM ** 0.5)

    # head_vec rows: 0 = emb_ln_g, 1 = emb_ln_b, 2 = pool_b
    head_vec = head_vec_ref[...]                                    # (3, H) f32

    # embedding LayerNorm (f32); activation x stays resident in VMEM for the whole kernel
    x = _layernorm(emb_ref[...].astype(jnp.float32).reshape(B * S, H),
                   head_vec[0:1, :], head_vec[1:2, :])

    # additive key-mask bias, replicated once for the head-batched scores: (N_HEADS*B, 1, S)
    bias3 = bias_ref[...][:, None, :]
    bias_b = jnp.concatenate([bias3] * N_HEADS, axis=0)

    def split_heads(t):  # (B*S, H) -> (N_HEADS*B, S, HEAD_DIM), head-major along axis 0
        t3 = t.reshape(B, S, H)
        return jnp.concatenate(
            [t3[:, :, h * HEAD_DIM:(h + 1) * HEAD_DIM] for h in range(N_HEADS)], axis=0)

    for l in range(N_LAYERS):                    # static unroll; all weights resident in VMEM
        vl = vec_ref[l]                          # (9, H) f32: bq,bk,bv,bo,ln1g,ln1b,b2,ln2g,ln2b
        wqkvo = wqkvo_ref[l]                     # (H, 4H) bf16: [Wq | Wk | Wv | Wo]

        # ---- self-attention: fused QKV projection (one H x 3H MXU matmul) ----
        qkv = _mxu_dot(x, wqkvo[:, :3 * H])      # (B*S, 3H) f32
        q = qkv[:, 0 * H:1 * H] + vl[0:1, :]
        k = qkv[:, 1 * H:2 * H] + vl[1:2, :]
        v = qkv[:, 2 * H:3 * H] + vl[2:3, :]

        # single batched einsum pair over one collapsed batch dim of size N_HEADS*B
        qh, kh, vh = split_heads(q), split_heads(k), split_heads(v)
        s = jnp.einsum('bqd,bkd->bqk',
                       qh.astype(jnp.bfloat16), kh.astype(jnp.bfloat16),
                       preferred_element_type=jnp.float32) * scale
        s = s + bias_b
        s = s - jnp.max(s, axis=-1, keepdims=True)
        p = jnp.exp(s)
        # NOTE: approx reciprocal (EUP slot); a fully-masked query row would yield Inf/NaN here.
        p = p * pl.reciprocal(jnp.sum(p, axis=-1, keepdims=True), approx=True)
        ctx_h = jnp.einsum('bqk,bkd->bqd',
                           p.astype(jnp.bfloat16), vh.astype(jnp.bfloat16),
                           preferred_element_type=jnp.float32)      # (N_HEADS*B, S, HEAD_DIM)

        # merge heads back: (N_HEADS*B, S, HD) -> (B, S, H) -> (B*S, H)
        ctx = jnp.concatenate([ctx_h[h * B:(h + 1) * B] for h in range(N_HEADS)], axis=-1)
        ctx = ctx.reshape(B * S, H)

        attn = _mxu_dot(ctx, wqkvo[:, 3 * H:]) + vl[3:4, :]          # output projection
        x = _layernorm(x + attn, vl[4:5, :], vl[5:6, :])             # post-LN residual (BERT)

        # ---- feed-forward ----
        h1 = jax.nn.gelu(_mxu_dot(x, w1_ref[l]) + b1_ref[l], approximate=True)
        h2 = _mxu_dot(h1, w2_ref[l]) + vl[6:7, :]
        x = _layernorm(x + h2, vl[7:8, :], vl[8:9, :])

    # ---- pooler + dropout + classifier on the resident activation (no extra launch) ----
    cls = x.reshape(B, S, H)[:, 0, :]                                # (B, H) == [CLS] row
    head_w = head_w_ref[...]                                         # (H, H+LOGIT_PAD) bf16
    pooled = jnp.tanh(_mxu_dot(cls, head_w[:, :H]) + head_vec[2:3, :])
    if training:                                                     # nn.Dropout(p=0.3)
        # TODO(synk): caller must vary dropout_seed per step for independent masks.
        pltpu.prng_seed(seed_ref[0])
        bits = pltpu.bitcast(pltpu.prng_random_bits(pooled.shape), jnp.uint32)
        u = pltpu.bitcast((bits >> 9) | jnp.uint32(0x3F800000), jnp.float32) - 1.0
        keep = (u >= DROPOUT_P).astype(jnp.float32)
        pooled = pooled * keep * (1.0 / (1.0 - DROPOUT_P))
    # lane-dense (B, 128) padded logits; wrapper slices [:, :N_CLASSES]
    o_ref[...] = _mxu_dot(pooled, head_w[:, H:]) + fc_b_ref[...]


# --------------------------------- parameters ----------------------------------
def init_params(key):
    keys = iter(jax.random.split(key, 64))

    def nrm(shape, std=0.02):
        return (std * jax.random.normal(next(keys), shape)).astype(jnp.float32)

    L, H, I = N_LAYERS, HIDDEN, INTERMEDIATE
    params = {
        'tok_emb': nrm((VOCAB, H)),
        'pos_emb': nrm((MAX_POS, H)),
        'type_emb': nrm((1, H)),
        'emb_ln_g': jnp.ones((1, H), jnp.float32),
        'emb_ln_b': jnp.zeros((1, H), jnp.float32),
        # stacked per-layer encoder weights (leading dim = layer); all (in, out) layout
        'wq': nrm((L, H, H)), 'bq': jnp.zeros((L, 1, H), jnp.float32),
        'wk': nrm((L, H, H)), 'bk': jnp.zeros((L, 1, H), jnp.float32),
        'wv': nrm((L, H, H)), 'bv': jnp.zeros((L, 1, H), jnp.float32),
        'wo': nrm((L, H, H)), 'bo': jnp.zeros((L, 1, H), jnp.float32),
        'ln1_g': jnp.ones((L, 1, H), jnp.float32), 'ln1_b': jnp.zeros((L, 1, H), jnp.float32),
        'w1': nrm((L, H, I)), 'b1': jnp.zeros((L, 1, I), jnp.float32),
        'w2': nrm((L, I, H)), 'b2': jnp.zeros((L, 1, H), jnp.float32),
        'ln2_g': jnp.ones((L, 1, H), jnp.float32), 'ln2_b': jnp.zeros((L, 1, H), jnp.float32),
        'pool_w': nrm((H, H)), 'pool_b': jnp.zeros((1, H), jnp.float32),
        # nn.init.normal_(fc.weight, std=0.02); nn.init.normal_(fc.bias, 0) -> mean 0, std 1
        'fc_w': nrm((H, N_CLASSES), std=0.02),
        'fc_b': jax.random.normal(next(keys), (1, N_CLASSES)).astype(jnp.float32),
    }
    return params


def pack_params(params):
    """Pack the 25 logical parameter tensors into 8 kernel slabs (bf16 for MXU weights)."""
    H = HIDDEN
    # per-layer matmul weights: [Wq | Wk | Wv | Wo]  -> (L, H, 4H) bf16
    wqkvo = jnp.concatenate(
        [params['wq'], params['wk'], params['wv'], params['wo']], axis=-1).astype(jnp.bfloat16)
    # per-layer H-wide vectors -> (L, 9, H) f32
    vec = jnp.concatenate(
        [params['bq'], params['bk'], params['bv'], params['bo'],
         params['ln1_g'], params['ln1_b'], params['b2'],
         params['ln2_g'], params['ln2_b']], axis=1)
    w1 = params['w1'].astype(jnp.bfloat16)
    w2 = params['w2'].astype(jnp.bfloat16)
    b1 = params['b1']
    # head-side small vectors -> (3, H) f32
    head_vec = jnp.concatenate([params['emb_ln_g'], params['emb_ln_b'], params['pool_b']], axis=0)
    # pooler weight + lane-dense padded classifier weight -> (H, H + LOGIT_PAD) bf16
    fc_w_pad = jnp.zeros((H, LOGIT_PAD), jnp.float32).at[:, :N_CLASSES].set(params['fc_w'])
    head_w = jnp.concatenate([params['pool_w'], fc_w_pad], axis=1).astype(jnp.bfloat16)
    fc_b_pad = jnp.zeros((1, LOGIT_PAD), jnp.float32).at[:, :N_CLASSES].set(params['fc_b'])
    return wqkvo, w1, w2, vec, b1, head_vec, head_w, fc_b_pad


# ---------------------------------- forward ------------------------------------
def sentiment_classifier_forward(params, input_ids, attention_mask,
                                 training=False, dropout_seed=0):
    B, S = input_ids.shape
    # embeddings (gather stays in JAX glue); emitted in bf16 to halve the activation DMA
    tok = jnp.take(params['tok_emb'], input_ids, axis=0)           # (B, S, H)
    pos = params['pos_emb'][:S][None, :, :]                        # (1, S, H)
    typ = params['type_emb'][None, :, :]                           # (1, 1, H)
    emb = (tok + pos + typ).astype(jnp.bfloat16)

    # additive attention-mask bias (HF-style extended mask), keys only
    mask_bias = (1.0 - attention_mask.astype(jnp.float32)) * -1e9  # (B, S)

    wqkvo, w1, w2, vec, b1, head_vec, head_w, fc_b_pad = pack_params(params)
    seed = jnp.array([dropout_seed], jnp.int32)

    in_specs = ([pl.BlockSpec(memory_space=_VMEM) for _ in range(10)]
                + [pl.BlockSpec(memory_space=_SMEM)])

    logits_pad = pl.pallas_call(
        functools.partial(fused_forward_kernel, training=training),
        out_shape=jax.ShapeDtypeStruct((B, LOGIT_PAD), jnp.float32),
        in_specs=in_specs,
        out_specs=pl.BlockSpec(memory_space=_VMEM),
    )(emb, mask_bias, head_vec,
      wqkvo, w1, w2, vec, b1,
      head_w, fc_b_pad, seed)

    return logits_pad[:, :N_CLASSES]


if __name__ == "__main__":
    key = jax.random.PRNGKey(0)
    pkey, ikey = jax.random.split(key)

    params = init_params(pkey)
    input_ids = jax.random.randint(ikey, (2, 8), 0, VOCAB, dtype=jnp.int32)
    attention_mask = jnp.array([[1, 1, 1, 1, 1, 1, 0, 0],
                                [1, 1, 1, 1, 1, 1, 1, 1]], dtype=jnp.int32)

    logits = sentiment_classifier_forward(params, input_ids, attention_mask,
                                          training=False)
    logits = jax.block_until_ready(logits)
    assert logits.shape == (2, N_CLASSES)
    assert bool(jnp.all(jnp.isfinite(logits)))
    print("KERNEL_OK")
</pallas_src>

<mosaic_0001>
module attributes {stable_mosaic.version = 11 : i64} {
  func.func @fused_forward_kernel(%arg0: memref<2x8x32xbf16, #tpu.memory_space<vmem>>, %arg1: memref<2x8xf32, #tpu.memory_space<vmem>>, %arg2: memref<3x32xf32, #tpu.memory_space<vmem>>, %arg3: memref<2x32x128xbf16, #tpu.memory_space<vmem>>, %arg4: memref<2x32x64xbf16, #tpu.memory_space<vmem>>, %arg5: memref<2x64x32xbf16, #tpu.memory_space<vmem>>, %arg6: memref<2x9x32xf32, #tpu.memory_space<vmem>>, %arg7: memref<2x1x64xf32, #tpu.memory_space<vmem>>, %arg8: memref<32x160xbf16, #tpu.memory_space<vmem>>, %arg9: memref<1x128xf32, #tpu.memory_space<vmem>>, %arg10: memref<1xi32, #tpu.memory_space<smem>>, %arg11: memref<2x128xf32, #tpu.memory_space<vmem>>) attributes {dimension_semantics = [], scalar_prefetch = 0 : i64, scratch_operands = 0 : i64, tpu.core_type = #tpu.core_type<tc>} {
    %c0 = arith.constant 0 : index
    %c0_0 = arith.constant 0 : index
    %0 = vector.load %arg2[%c0, %c0_0] : memref<3x32xf32, #tpu.memory_space<vmem>>, vector<3x32xf32>
    %c0_1 = arith.constant 0 : index
    %c0_2 = arith.constant 0 : index
    %c0_3 = arith.constant 0 : index
    %1 = vector.load %arg0[%c0_1, %c0_2, %c0_3] : memref<2x8x32xbf16, #tpu.memory_space<vmem>>, vector<2x8x32xbf16>
    %2 = arith.extf %1 : vector<2x8x32xbf16> to vector<2x8x32xf32>
    %3 = vector.shape_cast %2 : vector<2x8x32xf32> to vector<16x32xf32>
    %4 = vector.extract_strided_slice %0 {offsets = [0, 0], sizes = [1, 32], strides = [1, 1]} : vector<3x32xf32> to vector<1x32xf32>
    %5 = vector.extract_strided_slice %0 {offsets = [1, 0], sizes = [1, 32], strides = [1, 1]} : vector<3x32xf32> to vector<1x32xf32>
    %cst = arith.constant dense<0.000000e+00> : vector<16xf32>
    %6 = vector.multi_reduction <add>, %3, %cst [1] : vector<16x32xf32> to vector<16xf32>
    %7 = vector.shape_cast %6 : vector<16xf32> to vector<16x1xf32>
    %cst_4 = arith.constant 3.200000e+01 : f32
    %8 = vector.broadcast %cst_4 : f32 to vector<16x1xf32>
    %9 = arith.divf %7, %8 : vector<16x1xf32>
    %10 = vector.broadcast %9 : vector<16x1xf32> to vector<16x32xf32>
    %11 = arith.subf %3, %10 : vector<16x32xf32>
    %12 = arith.mulf %11, %11 : vector<16x32xf32>
    %cst_5 = arith.constant dense<0.000000e+00> : vector<16xf32>
    %13 = vector.multi_reduction <add>, %12, %cst_5 [1] : vector<16x32xf32> to vector<16xf32>
    %14 = vector.shape_cast %13 : vector<16xf32> to vector<16x1xf32>
    %cst_6 = arith.constant 3.200000e+01 : f32
    %15 = vector.broadcast %cst_6 : f32 to vector<16x1xf32>
    %16 = arith.divf %14, %15 : vector<16x1xf32>
    %17 = vector.broadcast %9 : vector<16x1xf32> to vector<16x32xf32>
    %18 = arith.subf %3, %17 : vector<16x32xf32>
    %cst_7 = arith.constant 9.99999996E-13 : f32
    %19 = vector.broadcast %cst_7 : f32 to vector<16x1xf32>
    %20 = arith.addf %16, %19 : vector<16x1xf32>
    %21 = math.rsqrt %20 : vector<16x1xf32>
    %22 = vector.broadcast %21 : vector<16x1xf32> to vector<16x32xf32>
    %23 = arith.mulf %18, %22 : vector<16x32xf32>
    %24 = vector.broadcast %4 : vector<1x32xf32> to vector<16x32xf32>
    %25 = arith.mulf %23, %24 : vector<16x32xf32>
    %26 = vector.broadcast %5 : vector<1x32xf32> to vector<16x32xf32>
    %27 = arith.addf %25, %26 : vector<16x32xf32>
    %c0_8 = arith.constant 0 : index
    %c0_9 = arith.constant 0 : index
    %28 = vector.load %arg1[%c0_8, %c0_9] : memref<2x8xf32, #tpu.memory_space<vmem>>, vector<2x8xf32>
    %29 = vector.shape_cast %28 : vector<2x8xf32> to vector<2x1x8xf32>
    %30 = tpu.concatenate %29, %29 in 0 : vector<2x1x8xf32>, vector<2x1x8xf32> -> vector<4x1x8xf32>
    %c0_10 = arith.constant 0 : index
    %c0_11 = arith.constant 0 : index
    %c0_12 = arith.constant 0 : index
    %31 = vector.load %arg6[%c0_10, %c0_11, %c0_12] : memref<2x9x32xf32, #tpu.memory_space<vmem>>, vector<1x9x32xf32>
    %32 = vector.shape_cast %31 : vector<1x9x32xf32> to vector<9x32xf32>
    %c0_13 = arith.constant 0 : index
    %c0_14 = arith.constant 0 : index
    %c0_15 = arith.constant 0 : index
    %33 = vector.load %arg3[%c0_13, %c0_14, %c0_15] : memref<2x32x128xbf16, #tpu.memory_space<vmem>>, vector<1x32x128xbf16>
    %34 = vector.shape_cast %33 : vector<1x32x128xbf16> to vector<32x128xbf16>
    %35 = vector.extract_strided_slice %34 {offsets = [0, 0], sizes = [32, 96], strides = [1, 1]} : vector<32x128xbf16> to vector<32x96xbf16>
    %36 = arith.truncf %27 : vector<16x32xf32> to vector<16x32xbf16>
    %cst_16 = arith.constant dense<0.000000e+00> : vector<16x96xf32>
    %37 = tpu.matmul %36, %35, %cst_16 {dimension_numbers = #tpu.dot_dimension_numbers<[1], [0], [0], [1], [0, 0, 1, 1], [], []>} : vector<16x32xbf16>, vector<32x96xbf16>, vector<16x96xf32> -> vector<16x96xf32>
    %38 = vector.extract_strided_slice %37 {offsets = [0, 0], sizes = [16, 32], strides = [1, 1]} : vector<16x96xf32> to vector<16x32xf32>
    %39 = vector.extract_strided_slice %32 {offsets = [0, 0], sizes = [1, 32], strides = [1, 1]} : vector<9x32xf32> to vector<1x32xf32>
    %40 = vector.broadcast %39 : vector<1x32xf32> to vector<16x32xf32>
    %41 = arith.addf %38, %40 : vector<16x32xf32>
    %42 = vector.extract_strided_slice %37 {offsets = [0, 32], sizes = [16, 32], strides = [1, 1]} : vector<16x96xf32> to vector<16x32xf32>
    %43 = vector.extract_strided_slice %32 {offsets = [1, 0], sizes = [1, 32], strides = [1, 1]} : vector<9x32xf32> to vector<1x32xf32>
    %44 = vector.broadcast %43 : vector<1x32xf32> to vector<16x32xf32>
    %45 = arith.addf %42, %44 : vector<16x32xf32>
    %46 = vector.extract_strided_slice %37 {offsets = [0, 64], sizes = [16, 32], strides = [1, 1]} : vector<16x96xf32> to vector<16x32xf32>
    %47 = vector.extract_strided_slice %32 {offsets = [2, 0], sizes = [1, 32], strides = [1, 1]} : vector<9x32xf32> to vector<1x32xf32>
    %48 = vector.broadcast %47 : vector<1x32xf32> to vector<16x32xf32>
    %49 = arith.addf %46, %48 : vector<16x32xf32>
    %50 = vector.shape_cast %41 : vector<16x32xf32> to vector<2x8x32xf32>
    %51 = vector.extract_strided_slice %50 {offsets = [0, 0, 0], sizes = [2, 8, 16], strides = [1, 1, 1]} : vector<2x8x32xf32> to vector<2x8x16xf32>
    %52 = vector.extract_strided_slice %50 {offsets = [0, 0, 16], sizes = [2, 8, 16], strides = [1, 1, 1]} : vector<2x8x32xf32> to vector<2x8x16xf32>
    %53 = tpu.concatenate %51, %52 in 0 : vector<2x8x16xf32>, vector<2x8x16xf32> -> vector<4x8x16xf32>
    %54 = vector.shape_cast %45 : vector<16x32xf32> to vector<2x8x32xf32>
    %55 = vector.extract_strided_slice %54 {offsets = [0, 0, 0], sizes = [2, 8, 16], strides = [1, 1, 1]} : vector<2x8x32xf32> to vector<2x8x16xf32>
    %56 = vector.extract_strided_slice %54 {offsets = [0, 0, 16], sizes = [2, 8, 16], strides = [1, 1, 1]} : vector<2x8x32xf32> to vector<2x8x16xf32>
    %57 = tpu.concatenate %55, %56 in 0 : vector<2x8x16xf32>, vector<2x8x16xf32> -> vector<4x8x16xf32>
    %58 = vector.shape_cast %49 : vector<16x32xf32> to vector<2x8x32xf32>
    %59 = vector.extract_strided_slice %58 {offsets = [0, 0, 0], sizes = [2, 8, 16], strides = [1, 1, 1]} : vector<2x8x32xf32> to vector<2x8x16xf32>
    %60 = vector.extract_strided_slice %58 {offsets = [0, 0, 16], sizes = [2, 8, 16], strides = [1, 1, 1]} : vector<2x8x32xf32> to vector<2x8x16xf32>
    %61 = tpu.concatenate %59, %60 in 0 : vector<2x8x16xf32>, vector<2x8x16xf32> -> vector<4x8x16xf32>
    %62 = arith.truncf %53 : vector<4x8x16xf32> to vector<4x8x16xbf16>
    %63 = arith.truncf %57 : vector<4x8x16xf32> to vector<4x8x16xbf16>
    "tpu.trace_start"() <{level = 10 : i32, message = "bqd,bkd->bqk"}> : () -> ()
    %cst_17 = arith.constant dense<0.000000e+00> : vector<4x8x8xf32>
    %64 = tpu.matmul %62, %63, %cst_17 {dimension_numbers = #tpu.dot_dimension_numbers<[2], [2], [1], [1], [0, 0, 0, 1, 1, 1], [0], [0]>} : vector<4x8x16xbf16>, vector<4x8x16xbf16>, vector<4x8x8xf32> -> vector<4x8x8xf32>
    "tpu.trace_stop"() : () -> ()
    %cst_18 = arith.constant 2.500000e-01 : f32
    %65 = vector.broadcast %cst_18 : f32 to vector<4x8x8xf32>
    %66 = arith.mulf %64, %65 : vector<4x8x8xf32>
    %67 = vector.broadcast %30 : vector<4x1x8xf32> to vector<4x8x8xf32>
    %68 = arith.addf %66, %67 : vector<4x8x8xf32>
    %cst_19 = arith.constant dense<0xFF800000> : vector<4x8xf32>
    %69 = vector.multi_reduction <maximumf>, %68, %cst_19 [2] : vector<4x8x8xf32> to vector<4x8xf32>
    %70 = vector.shape_cast %69 : vector<4x8xf32> to vector<4x8x1xf32>
    %71 = vector.broadcast %70 : vector<4x8x1xf32> to vector<4x8x8xf32>
    %72 = arith.subf %68, %71 : vector<4x8x8xf32>
    %73 = math.exp %72 : vector<4x8x8xf32>
    %cst_20 = arith.constant dense<0.000000e+00> : vector<4x8xf32>
    %74 = vector.multi_reduction <add>, %73, %cst_20 [2] : vector<4x8x8xf32> to vector<4x8xf32>
    %75 = vector.shape_cast %74 : vector<4x8xf32> to vector<4x8x1xf32>
    %76 = tpu.reciprocal %75 {approx = true} : vector<4x8x1xf32> -> vector<4x8x1xf32>
    %77 = vector.broadcast %76 : vector<4x8x1xf32> to vector<4x8x8xf32>
    %78 = arith.mulf %73, %77 : vector<4x8x8xf32>
    %79 = arith.truncf %78 : vector<4x8x8xf32> to vector<4x8x8xbf16>
    %80 = arith.truncf %61 : vector<4x8x16xf32> to vector<4x8x16xbf16>
    "tpu.trace_start"() <{level = 10 : i32, message = "bqk,bkd->bqd"}> : () -> ()
    %cst_21 = arith.constant dense<0.000000e+00> : vector<4x8x16xf32>
    %81 = tpu.matmul %79, %80, %cst_21 {dimension_numbers = #tpu.dot_dimension_numbers<[2], [1], [1], [2], [0, 0, 0, 1, 1, 2], [0], [0]>} : vector<4x8x8xbf16>, vector<4x8x16xbf16>, vector<4x8x16xf32> -> vector<4x8x16xf32>
    "tpu.trace_stop"() : () -> ()
    %82 = vector.extract_strided_slice %81 {offsets = [0, 0, 0], sizes = [2, 8, 16], strides = [1, 1, 1]} : vector<4x8x16xf32> to vector<2x8x16xf32>
    %83 = vector.extract_strided_slice %81 {offsets = [2, 0, 0], sizes = [2, 8, 16], strides = [1, 1, 1]} : vector<4x8x16xf32> to vector<2x8x16xf32>
    %84 = tpu.concatenate %82, %83 in 2 : vector<2x8x16xf32>, vector<2x8x16xf32> -> vector<2x8x32xf32>
    %85 = vector.shape_cast %84 : vector<2x8x32xf32> to vector<16x32xf32>
    %86 = vector.extract_strided_slice %34 {offsets = [0, 96], sizes = [32, 32], strides = [1, 1]} : vector<32x128xbf16> to vector<32x32xbf16>
    %87 = arith.truncf %85 : vector<16x32xf32> to vector<16x32xbf16>
    %cst_22 = arith.constant dense<0.000000e+00> : vector<16x32xf32>
    %88 = tpu.matmul %87, %86, %cst_22 {dimension_numbers = #tpu.dot_dimension_numbers<[1], [0], [0], [1], [0, 0, 1, 1], [], []>} : vector<16x32xbf16>, vector<32x32xbf16>, vector<16x32xf32> -> vector<16x32xf32>
    %89 = vector.extract_strided_slice %32 {offsets = [3, 0], sizes = [1, 32], strides = [1, 1]} : vector<9x32xf32> to vector<1x32xf32>
    %90 = vector.broadcast %89 : vector<1x32xf32> to vector<16x32xf32>
    %91 = arith.addf %88, %90 : vector<16x32xf32>
    %92 = arith.addf %27, %91 : vector<16x32xf32>
    %93 = vector.extract_strided_slice %32 {offsets = [4, 0], sizes = [1, 32], strides = [1, 1]} : vector<9x32xf32> to vector<1x32xf32>
    %94 = vector.extract_strided_slice %32 {offsets = [5, 0], sizes = [1, 32], strides = [1, 1]} : vector<9x32xf32> to vector<1x32xf32>
    %cst_23 = arith.constant dense<0.000000e+00> : vector<16xf32>
    %95 = vector.multi_reduction <add>, %92, %cst_23 [1] : vector<16x32xf32> to vector<16xf32>
    %96 = vector.shape_cast %95 : vector<16xf32> to vector<16x1xf32>
    %cst_24 = arith.constant 3.200000e+01 : f32
    %97 = vector.broadcast %cst_24 : f32 to vector<16x1xf32>
    %98 = arith.divf %96, %97 : vector<16x1xf32>
    %99 = vector.broadcast %98 : vector<16x1xf32> to vector<16x32xf32>
    %100 = arith.subf %92, %99 : vector<16x32xf32>
    %101 = arith.mulf %100, %100 : vector<16x32xf32>
    %cst_25 = arith.constant dense<0.000000e+00> : vector<16xf32>
    %102 = vector.multi_reduction <add>, %101, %cst_25 [1] : vector<16x32xf32> to vector<16xf32>
    %103 = vector.shape_cast %102 : vector<16xf32> to vector<16x1xf32>
    %cst_26 = arith.constant 3.200000e+01 : f32
    %104 = vector.broadcast %cst_26 : f32 to vector<16x1xf32>
    %105 = arith.divf %103, %104 : vector<16x1xf32>
    %106 = vector.broadcast %98 : vector<16x1xf32> to vector<16x32xf32>
    %107 = arith.subf %92, %106 : vector<16x32xf32>
    %cst_27 = arith.constant 9.99999996E-13 : f32
    %108 = vector.broadcast %cst_27 : f32 to vector<16x1xf32>
    %109 = arith.addf %105, %108 : vector<16x1xf32>
    %110 = math.rsqrt %109 : vector<16x1xf32>
    %111 = vector.broadcast %110 : vector<16x1xf32> to vector<16x32xf32>
    %112 = arith.mulf %107, %111 : vector<16x32xf32>
    %113 = vector.broadcast %93 : vector<1x32xf32> to vector<16x32xf32>
    %114 = arith.mulf %112, %113 : vector<16x32xf32>
    %115 = vector.broadcast %94 : vector<1x32xf32> to vector<16x32xf32>
    %116 = arith.addf %114, %115 : vector<16x32xf32>
    %c0_28 = arith.constant 0 : index
    %c0_29 = arith.constant 0 : index
    %c0_30 = arith.constant 0 : index
    %117 = vector.load %arg4[%c0_28, %c0_29, %c0_30] : memref<2x32x64xbf16, #tpu.memory_space<vmem>>, vector<1x32x64xbf16>
    %118 = vector.shape_cast %117 : vector<1x32x64xbf16> to vector<32x64xbf16>
    %119 = arith.truncf %116 : vector<16x32xf32> to vector<16x32xbf16>
    %cst_31 = arith.constant dense<0.000000e+00> : vector<16x64xf32>
    %120 = tpu.matmul %119, %118, %cst_31 {dimension_numbers = #tpu.dot_dimension_numbers<[1], [0], [0], [1], [0, 0, 1, 1], [], []>} : vector<16x32xbf16>, vector<32x64xbf16>, vector<16x64xf32> -> vector<16x64xf32>
    %c0_32 = arith.constant 0 : index
    %c0_33 = arith.constant 0 : index
    %c0_34 = arith.constant 0 : index
    %121 = vector.load %arg7[%c0_32, %c0_33, %c0_34] : memref<2x1x64xf32, #tpu.memory_space<vmem>>, vector<1x1x64xf32>
    %122 = vector.shape_cast %121 : vector<1x1x64xf32> to vector<1x64xf32>
    %123 = vector.broadcast %122 : vector<1x64xf32> to vector<16x64xf32>
    %124 = arith.addf %120, %123 : vector<16x64xf32>
    %125 = arith.mulf %124, %124 : vector<16x64xf32>
    %126 = arith.mulf %124, %125 : vector<16x64xf32>
    %cst_35 = arith.constant 4.471500e-02 : f32
    %127 = vector.broadcast %cst_35 : f32 to vector<16x64xf32>
    %128 = arith.mulf %127, %126 : vector<16x64xf32>
    %129 = arith.addf %124, %128 : vector<16x64xf32>
    %cst_36 = arith.constant 0.797884583 : f32
    %130 = vector.broadcast %cst_36 : f32 to vector<16x64xf32>
    %131 = arith.mulf %130, %129 : vector<16x64xf32>
    %132 = math.tanh %131 : vector<16x64xf32>
    %cst_37 = arith.constant 1.000000e+00 : f32
    %133 = vector.broadcast %cst_37 : f32 to vector<16x64xf32>
    %134 = arith.addf %133, %132 : vector<16x64xf32>
    %cst_38 = arith.constant 5.000000e-01 : f32
    %135 = vector.broadcast %cst_38 : f32 to vector<16x64xf32>
    %136 = arith.mulf %135, %134 : vector<16x64xf32>
    %137 = arith.mulf %124, %136 : vector<16x64xf32>
    %c0_39 = arith.constant 0 : index
    %c0_40 = arith.constant 0 : index
    %c0_41 = arith.constant 0 : index
    %138 = vector.load %arg5[%c0_39, %c0_40, %c0_41] : memref<2x64x32xbf16, #tpu.memory_space<vmem>>, vector<1x64x32xbf16>
    %139 = vector.shape_cast %138 : vector<1x64x32xbf16> to vector<64x32xbf16>
    %140 = arith.truncf %137 : vector<16x64xf32> to vector<16x64xbf16>
    %cst_42 = arith.constant dense<0.000000e+00> : vector<16x32xf32>
    %141 = tpu.matmul %140, %139, %cst_42 {dimension_numbers = #tpu.dot_dimension_numbers<[1], [0], [0], [1], [0, 0, 1, 1], [], []>} : vector<16x64xbf16>, vector<64x32xbf16>, vector<16x32xf32> -> vector<16x32xf32>
    %142 = vector.extract_strided_slice %32 {offsets = [6, 0], sizes = [1, 32], strides = [1, 1]} : vector<9x32xf32> to vector<1x32xf32>
    %143 = vector.broadcast %142 : vector<1x32xf32> to vector<16x32xf32>
    %144 = arith.addf %141, %143 : vector<16x32xf32>
    %145 = arith.addf %116, %144 : vector<16x32xf32>
    %146 = vector.extract_strided_slice %32 {offsets = [7, 0], sizes = [1, 32], strides = [1, 1]} : vector<9x32xf32> to vector<1x32xf32>
    %147 = vector.extract_strided_slice %32 {offsets = [8, 0], sizes = [1, 32], strides = [1, 1]} : vector<9x32xf32> to vector<1x32xf32>
    %cst_43 = arith.constant dense<0.000000e+00> : vector<16xf32>
    %148 = vector.multi_reduction <add>, %145, %cst_43 [1] : vector<16x32xf32> to vector<16xf32>
    %149 = vector.shape_cast %148 : vector<16xf32> to vector<16x1xf32>
    %cst_44 = arith.constant 3.200000e+01 : f32
    %150 = vector.broadcast %cst_44 : f32 to vector<16x1xf32>
    %151 = arith.divf %149, %150 : vector<16x1xf32>
    %152 = vector.broadcast %151 : vector<16x1xf32> to vector<16x32xf32>
    %153 = arith.subf %145, %152 : vector<16x32xf32>
    %154 = arith.mulf %153, %153 : vector<16x32xf32>
    %cst_45 = arith.constant dense<0.000000e+00> : vector<16xf32>
    %155 = vector.multi_reduction <add>, %154, %cst_45 [1] : vector<16x32xf32> to vector<16xf32>
    %156 = vector.shape_cast %155 : vector<16xf32> to vector<16x1xf32>
    %cst_46 = arith.constant 3.200000e+01 : f32
    %157 = vector.broadcast %cst_46 : f32 to vector<16x1xf32>
    %158 = arith.divf %156, %157 : vector<16x1xf32>
    %159 = vector.broadcast %151 : vector<16x1xf32> to vector<16x32xf32>
    %160 = arith.subf %145, %159 : vector<16x32xf32>
    %cst_47 = arith.constant 9.99999996E-13 : f32
    %161 = vector.broadcast %cst_47 : f32 to vector<16x1xf32>
    %162 = arith.addf %158, %161 : vector<16x1xf32>
    %163 = math.rsqrt %162 : vector<16x1xf32>
    %164 = vector.broadcast %163 : vector<16x1xf32> to vector<16x32xf32>
    %165 = arith.mulf %160, %164 : vector<16x32xf32>
    %166 = vector.broadcast %146 : vector<1x32xf32> to vector<16x32xf32>
    %167 = arith.mulf %165, %166 : vector<16x32xf32>
    %168 = vector.broadcast %147 : vector<1x32xf32> to vector<16x32xf32>
    %169 = arith.addf %167, %168 : vector<16x32xf32>
    %c1 = arith.constant 1 : index
    %c0_48 = arith.constant 0 : index
    %c0_49 = arith.constant 0 : index
    %170 = vector.load %arg6[%c1, %c0_48, %c0_49] : memref<2x9x32xf32, #tpu.memory_space<vmem>>, vector<1x9x32xf32>
    %171 = vector.shape_cast %170 : vector<1x9x32xf32> to vector<9x32xf32>
    %c1_50 = arith.constant 1 : index
    %c0_51 = arith.constant 0 : index
    %c0_52 = arith.constant 0 : index
    %172 = vector.load %arg3[%c1_50, %c0_51, %c0_52] : memref<2x32x128xbf16, #tpu.memory_space<vmem>>, vector<1x32x128xbf16>
    %173 = vector.shape_cast %172 : vector<1x32x128xbf16> to vector<32x128xbf16>
    %174 = vector.extract_strided_slice %173 {offsets = [0, 0], sizes = [32, 96], strides = [1, 1]} : vector<32x128xbf16> to vector<32x96xbf16>
    %175 = arith.truncf %169 : vector<16x32xf32> to vector<16x32xbf16>
    %cst_53 = arith.constant dense<0.000000e+00> : vector<16x96xf32>
    %176 = tpu.matmul %175, %174, %cst_53 {dimension_numbers = #tpu.dot_dimension_numbers<[1], [0], [0], [1], [0, 0, 1, 1], [], []>} : vector<16x32xbf16>, vector<32x96xbf16>, vector<16x96xf32> -> vector<16x96xf32>
    %177 = vector.extract_strided_slice %176 {offsets = [0, 0], sizes = [16, 32], strides = [1, 1]} : vector<16x96xf32> to vector<16x32xf32>
    %178 = vector.extract_strided_slice %171 {offsets = [0, 0], sizes = [1, 32], strides = [1, 1]} : vector<9x32xf32> to vector<1x32xf32>
    %179 = vector.broadcast %178 : vector<1x32xf32> to vector<16x32xf32>
    %180 = arith.addf %177, %179 : vector<16x32xf32>
    %181 = vector.extract_strided_slice %176 {offsets = [0, 32], sizes = [16, 32], strides = [1, 1]} : vector<16x96xf32> to vector<16x32xf32>
    %182 = vector.extract_strided_slice %171 {offsets = [1, 0], sizes = [1, 32], strides = [1, 1]} : vector<9x32xf32> to vector<1x32xf32>
    %183 = vector.broadcast %182 : vector<1x32xf32> to vector<16x32xf32>
    %184 = arith.addf %181, %183 : vector<16x32xf32>
    %185 = vector.extract_strided_slice %176 {offsets = [0, 64], sizes = [16, 32], strides = [1, 1]} : vector<16x96xf32> to vector<16x32xf32>
    %186 = vector.extract_strided_slice %171 {offsets = [2, 0], sizes = [1, 32], strides = [1, 1]} : vector<9x32xf32> to vector<1x32xf32>
    %187 = vector.broadcast %186 : vector<1x32xf32> to vector<16x32xf32>
    %188 = arith.addf %185, %187 : vector<16x32xf32>
    %189 = vector.shape_cast %180 : vector<16x32xf32> to vector<2x8x32xf32>
    %190 = vector.extract_strided_slice %189 {offsets = [0, 0, 0], sizes = [2, 8, 16], strides = [1, 1, 1]} : vector<2x8x32xf32> to vector<2x8x16xf32>
    %191 = vector.extract_strided_slice %189 {offsets = [0, 0, 16], sizes = [2, 8, 16], strides = [1, 1, 1]} : vector<2x8x32xf32> to vector<2x8x16xf32>
    %192 = tpu.concatenate %190, %191 in 0 : vector<2x8x16xf32>, vector<2x8x16xf32> -> vector<4x8x16xf32>
    %193 = vector.shape_cast %184 : vector<16x32xf32> to vector<2x8x32xf32>
    %194 = vector.extract_strided_slice %193 {offsets = [0, 0, 0], sizes = [2, 8, 16], strides = [1, 1, 1]} : vector<2x8x32xf32> to vector<2x8x16xf32>
    %195 = vector.extract_strided_slice %193 {offsets = [0, 0, 16], sizes = [2, 8, 16], strides = [1, 1, 1]} : vector<2x8x32xf32> to vector<2x8x16xf32>
    %196 = tpu.concatenate %194, %195 in 0 : vector<2x8x16xf32>, vector<2x8x16xf32> -> vector<4x8x16xf32>
    %197 = vector.shape_cast %188 : vector<16x32xf32> to vector<2x8x32xf32>
    %198 = vector.extract_strided_slice %197 {offsets = [0, 0, 0], sizes = [2, 8, 16], strides = [1, 1, 1]} : vector<2x8x32xf32> to vector<2x8x16xf32>
    %199 = vector.extract_strided_slice %197 {offsets = [0, 0, 16], sizes = [2, 8, 16], strides = [1, 1, 1]} : vector<2x8x32xf32> to vector<2x8x16xf32>
    %200 = tpu.concatenate %198, %199 in 0 : vector<2x8x16xf32>, vector<2x8x16xf32> -> vector<4x8x16xf32>
    %201 = arith.truncf %192 : vector<4x8x16xf32> to vector<4x8x16xbf16>
    %202 = arith.truncf %196 : vector<4x8x16xf32> to vector<4x8x16xbf16>
    "tpu.trace_start"() <{level = 10 : i32, message = "bqd,bkd->bqk"}> : () -> ()
    %cst_54 = arith.constant dense<0.000000e+00> : vector<4x8x8xf32>
    %203 = tpu.matmul %201, %202, %cst_54 {dimension_numbers = #tpu.dot_dimension_numbers<[2], [2], [1], [1], [0, 0, 0, 1, 1, 1], [0], [0]>} : vector<4x8x16xbf16>, vector<4x8x16xbf16>, vector<4x8x8xf32> -> vector<4x8x8xf32>
    "tpu.trace_stop"() : () -> ()
    %cst_55 = arith.constant 2.500000e-01 : f32
    %204 = vector.broadcast %cst_55 : f32 to vector<4x8x8xf32>
    %205 = arith.mulf %203, %204 : vector<4x8x8xf32>
    %206 = vector.broadcast %30 : vector<4x1x8xf32> to vector<4x8x8xf32>
    %207 = arith.addf %205, %206 : vector<4x8x8xf32>
    %cst_56 = arith.constant dense<0xFF800000> : vector<4x8xf32>
    %208 = vector.multi_reduction <maximumf>, %207, %cst_56 [2] : vector<4x8x8xf32> to vector<4x8xf32>
    %209 = vector.shape_cast %208 : vector<4x8xf32> to vector<4x8x1xf32>
    %210 = vector.broadcast %209 : vector<4x8x1xf32> to vector<4x8x8xf32>
    %211 = arith.subf %207, %210 : vector<4x8x8xf32>
    %212 = math.exp %211 : vector<4x8x8xf32>
    %cst_57 = arith.constant dense<0.000000e+00> : vector<4x8xf32>
    %213 = vector.multi_reduction <add>, %212, %cst_57 [2] : vector<4x8x8xf32> to vector<4x8xf32>
    %214 = vector.shape_cast %213 : vector<4x8xf32> to vector<4x8x1xf32>
    %215 = tpu.reciprocal %214 {approx = true} : vector<4x8x1xf32> -> vector<4x8x1xf32>
    %216 = vector.broadcast %215 : vector<4x8x1xf32> to vector<4x8x8xf32>
    %217 = arith.mulf %212, %216 : vector<4x8x8xf32>
    %218 = arith.truncf %217 : vector<4x8x8xf32> to vector<4x8x8xbf16>
    %219 = arith.truncf %200 : vector<4x8x16xf32> to vector<4x8x16xbf16>
    "tpu.trace_start"() <{level = 10 : i32, message = "bqk,bkd->bqd"}> : () -> ()
    %cst_58 = arith.constant dense<0.000000e+00> : vector<4x8x16xf32>
    %220 = tpu.matmul %218, %219, %cst_58 {dimension_numbers = #tpu.dot_dimension_numbers<[2], [1], [1], [2], [0, 0, 0, 1, 1, 2], [0], [0]>} : vector<4x8x8xbf16>, vector<4x8x16xbf16>, vector<4x8x16xf32> -> vector<4x8x16xf32>
    "tpu.trace_stop"() : () -> ()
    %221 = vector.extract_strided_slice %220 {offsets = [0, 0, 0], sizes = [2, 8, 16], strides = [1, 1, 1]} : vector<4x8x16xf32> to vector<2x8x16xf32>
    %222 = vector.extract_strided_slice %220 {offsets = [2, 0, 0], sizes = [2, 8, 16], strides = [1, 1, 1]} : vector<4x8x16xf32> to vector<2x8x16xf32>
    %223 = tpu.concatenate %221, %222 in 2 : vector<2x8x16xf32>, vector<2x8x16xf32> -> vector<2x8x32xf32>
    %224 = vector.shape_cast %223 : vector<2x8x32xf32> to vector<16x32xf32>
    %225 = vector.extract_strided_slice %173 {offsets = [0, 96], sizes = [32, 32], strides = [1, 1]} : vector<32x128xbf16> to vector<32x32xbf16>
    %226 = arith.truncf %224 : vector<16x32xf32> to vector<16x32xbf16>
    %cst_59 = arith.constant dense<0.000000e+00> : vector<16x32xf32>
    %227 = tpu.matmul %226, %225, %cst_59 {dimension_numbers = #tpu.dot_dimension_numbers<[1], [0], [0], [1], [0, 0, 1, 1], [], []>} : vector<16x32xbf16>, vector<32x32xbf16>, vector<16x32xf32> -> vector<16x32xf32>
    %228 = vector.extract_strided_slice %171 {offsets = [3, 0], sizes = [1, 32], strides = [1, 1]} : vector<9x32xf32> to vector<1x32xf32>
    %229 = vector.broadcast %228 : vector<1x32xf32> to vector<16x32xf32>
    %230 = arith.addf %227, %229 : vector<16x32xf32>
    %231 = arith.addf %169, %230 : vector<16x32xf32>
    %232 = vector.extract_strided_slice %171 {offsets = [4, 0], sizes = [1, 32], strides = [1, 1]} : vector<9x32xf32> to vector<1x32xf32>
    %233 = vector.extract_strided_slice %171 {offsets = [5, 0], sizes = [1, 32], strides = [1, 1]} : vector<9x32xf32> to vector<1x32xf32>
    %cst_60 = arith.constant dense<0.000000e+00> : vector<16xf32>
    %234 = vector.multi_reduction <add>, %231, %cst_60 [1] : vector<16x32xf32> to vector<16xf32>
    %235 = vector.shape_cast %234 : vector<16xf32> to vector<16x1xf32>
    %cst_61 = arith.constant 3.200000e+01 : f32
    %236 = vector.broadcast %cst_61 : f32 to vector<16x1xf32>
    %237 = arith.divf %235, %236 : vector<16x1xf32>
    %238 = vector.broadcast %237 : vector<16x1xf32> to vector<16x32xf32>
    %239 = arith.subf %231, %238 : vector<16x32xf32>
    %240 = arith.mulf %239, %239 : vector<16x32xf32>
    %cst_62 = arith.constant dense<0.000000e+00> : vector<16xf32>
    %241 = vector.multi_reduction <add>, %240, %cst_62 [1] : vector<16x32xf32> to vector<16xf32>
    %242 = vector.shape_cast %241 : vector<16xf32> to vector<16x1xf32>
    %cst_63 = arith.constant 3.200000e+01 : f32
    %243 = vector.broadcast %cst_63 : f32 to vector<16x1xf32>
    %244 = arith.divf %242, %243 : vector<16x1xf32>
    %245 = vector.broadcast %237 : vector<16x1xf32> to vector<16x32xf32>
    %246 = arith.subf %231, %245 : vector<16x32xf32>
    %cst_64 = arith.constant 9.99999996E-13 : f32
    %247 = vector.broadcast %cst_64 : f32 to vector<16x1xf32>
    %248 = arith.addf %244, %247 : vector<16x1xf32>
    %249 = math.rsqrt %248 : vector<16x1xf32>
    %250 = vector.broadcast %249 : vector<16x1xf32> to vector<16x32xf32>
    %251 = arith.mulf %246, %250 : vector<16x32xf32>
    %252 = vector.broadcast %232 : vector<1x32xf32> to vector<16x32xf32>
    %253 = arith.mulf %251, %252 : vector<16x32xf32>
    %254 = vector.broadcast %233 : vector<1x32xf32> to vector<16x32xf32>
    %255 = arith.addf %253, %254 : vector<16x32xf32>
    %c1_65 = arith.constant 1 : index
    %c0_66 = arith.constant 0 : index
    %c0_67 = arith.constant 0 : index
    %256 = vector.load %arg4[%c1_65, %c0_66, %c0_67] : memref<2x32x64xbf16, #tpu.memory_space<vmem>>, vector<1x32x64xbf16>
    %257 = vector.shape_cast %256 : vector<1x32x64xbf16> to vector<32x64xbf16>
    %258 = arith.truncf %255 : vector<16x32xf32> to vector<16x32xbf16>
    %cst_68 = arith.constant dense<0.000000e+00> : vector<16x64xf32>
    %259 = tpu.matmul %258, %257, %cst_68 {dimension_numbers = #tpu.dot_dimension_numbers<[1], [0], [0], [1], [0, 0, 1, 1], [], []>} : vector<16x32xbf16>, vector<32x64xbf16>, vector<16x64xf32> -> vector<16x64xf32>
    %c1_69 = arith.constant 1 : index
    %c0_70 = arith.constant 0 : index
    %c0_71 = arith.constant 0 : index
    %260 = vector.load %arg7[%c1_69, %c0_70, %c0_71] : memref<2x1x64xf32, #tpu.memory_space<vmem>>, vector<1x1x64xf32>
    %261 = vector.shape_cast %260 : vector<1x1x64xf32> to vector<1x64xf32>
    %262 = vector.broadcast %261 : vector<1x64xf32> to vector<16x64xf32>
    %263 = arith.addf %259, %262 : vector<16x64xf32>
    %264 = arith.mulf %263, %263 : vector<16x64xf32>
    %265 = arith.mulf %263, %264 : vector<16x64xf32>
    %cst_72 = arith.constant 4.471500e-02 : f32
    %266 = vector.broadcast %cst_72 : f32 to vector<16x64xf32>
    %267 = arith.mulf %266, %265 : vector<16x64xf32>
    %268 = arith.addf %263, %267 : vector<16x64xf32>
    %cst_73 = arith.constant 0.797884583 : f32
    %269 = vector.broadcast %cst_73 : f32 to vector<16x64xf32>
    %270 = arith.mulf %269, %268 : vector<16x64xf32>
    %271 = math.tanh %270 : vector<16x64xf32>
    %cst_74 = arith.constant 1.000000e+00 : f32
    %272 = vector.broadcast %cst_74 : f32 to vector<16x64xf32>
    %273 = arith.addf %272, %271 : vector<16x64xf32>
    %cst_75 = arith.constant 5.000000e-01 : f32
    %274 = vector.broadcast %cst_75 : f32 to vector<16x64xf32>
    %275 = arith.mulf %274, %273 : vector<16x64xf32>
    %276 = arith.mulf %263, %275 : vector<16x64xf32>
    %c1_76 = arith.constant 1 : index
    %c0_77 = arith.constant 0 : index
    %c0_78 = arith.constant 0 : index
    %277 = vector.load %arg5[%c1_76, %c0_77, %c0_78] : memref<2x64x32xbf16, #tpu.memory_space<vmem>>, vector<1x64x32xbf16>
    %278 = vector.shape_cast %277 : vector<1x64x32xbf16> to vector<64x32xbf16>
    %279 = arith.truncf %276 : vector<16x64xf32> to vector<16x64xbf16>
    %cst_79 = arith.constant dense<0.000000e+00> : vector<16x32xf32>
    %280 = tpu.matmul %279, %278, %cst_79 {dimension_numbers = #tpu.dot_dimension_numbers<[1], [0], [0], [1], [0, 0, 1, 1], [], []>} : vector<16x64xbf16>, vector<64x32xbf16>, vector<16x32xf32> -> vector<16x32xf32>
    %281 = vector.extract_strided_slice %171 {offsets = [6, 0], sizes = [1, 32], strides = [1, 1]} : vector<9x32xf32> to vector<1x32xf32>
    %282 = vector.broadcast %281 : vector<1x32xf32> to vector<16x32xf32>
    %283 = arith.addf %280, %282 : vector<16x32xf32>
    %284 = arith.addf %255, %283 : vector<16x32xf32>
    %285 = vector.extract_strided_slice %171 {offsets = [7, 0], sizes = [1, 32], strides = [1, 1]} : vector<9x32xf32> to vector<1x32xf32>
    %286 = vector.extract_strided_slice %171 {offsets = [8, 0], sizes = [1, 32], strides = [1, 1]} : vector<9x32xf32> to vector<1x32xf32>
    %cst_80 = arith.constant dense<0.000000e+00> : vector<16xf32>
    %287 = vector.multi_reduction <add>, %284, %cst_80 [1] : vector<16x32xf32> to vector<16xf32>
    %288 = vector.shape_cast %287 : vector<16xf32> to vector<16x1xf32>
    %cst_81 = arith.constant 3.200000e+01 : f32
    %289 = vector.broadcast %cst_81 : f32 to vector<16x1xf32>
    %290 = arith.divf %288, %289 : vector<16x1xf32>
    %291 = vector.broadcast %290 : vector<16x1xf32> to vector<16x32xf32>
    %292 = arith.subf %284, %291 : vector<16x32xf32>
    %293 = arith.mulf %292, %292 : vector<16x32xf32>
    %cst_82 = arith.constant dense<0.000000e+00> : vector<16xf32>
    %294 = vector.multi_reduction <add>, %293, %cst_82 [1] : vector<16x32xf32> to vector<16xf32>
    %295 = vector.shape_cast %294 : vector<16xf32> to vector<16x1xf32>
    %cst_83 = arith.constant 3.200000e+01 : f32
    %296 = vector.broadcast %cst_83 : f32 to vector<16x1xf32>
    %297 = arith.divf %295, %296 : vector<16x1xf32>
    %298 = vector.broadcast %290 : vector<16x1xf32> to vector<16x32xf32>
    %299 = arith.subf %284, %298 : vector<16x32xf32>
    %cst_84 = arith.constant 9.99999996E-13 : f32
    %300 = vector.broadcast %cst_84 : f32 to vector<16x1xf32>
    %301 = arith.addf %297, %300 : vector<16x1xf32>
    %302 = math.rsqrt %301 : vector<16x1xf32>
    %303 = vector.broadcast %302 : vector<16x1xf32> to vector<16x32xf32>
    %304 = arith.mulf %299, %303 : vector<16x32xf32>
    %305 = vector.broadcast %285 : vector<1x32xf32> to vector<16x32xf32>
    %306 = arith.mulf %304, %305 : vector<16x32xf32>
    %307 = vector.broadcast %286 : vector<1x32xf32> to vector<16x32xf32>
    %308 = arith.addf %306, %307 : vector<16x32xf32>
    %309 = vector.shape_cast %308 : vector<16x32xf32> to vector<2x8x32xf32>
    %310 = vector.extract_strided_slice %309 {offsets = [0, 0, 0], sizes = [2, 1, 32], strides = [1, 1, 1]} : vector<2x8x32xf32> to vector<2x1x32xf32>
    %311 = vector.shape_cast %310 : vector<2x1x32xf32> to vector<2x32xf32>
    %c0_85 = arith.constant 0 : index
    %c0_86 = arith.constant 0 : index
    %312 = vector.load %arg8[%c0_85, %c0_86] : memref<32x160xbf16, #tpu.memory_space<vmem>>, vector<32x160xbf16>
    %313 = vector.extract_strided_slice %312 {offsets = [0, 0], sizes = [32, 32], strides = [1, 1]} : vector<32x160xbf16> to vector<32x32xbf16>
    %314 = arith.truncf %311 : vector<2x32xf32> to vector<2x32xbf16>
    %cst_87 = arith.constant dense<0.000000e+00> : vector<2x32xf32>
    %315 = tpu.matmul %314, %313, %cst_87 {dimension_numbers = #tpu.dot_dimension_numbers<[1], [0], [0], [1], [0, 0, 1, 1], [], []>} : vector<2x32xbf16>, vector<32x32xbf16>, vector<2x32xf32> -> vector<2x32xf32>
    %316 = vector.extract_strided_slice %0 {offsets = [2, 0], sizes = [1, 32], strides = [1, 1]} : vector<3x32xf32> to vector<1x32xf32>
    %317 = vector.broadcast %316 : vector<1x32xf32> to vector<2x32xf32>
    %318 = arith.addf %315, %317 : vector<2x32xf32>
    %319 = math.tanh %318 : vector<2x32xf32>
    %320 = vector.extract_strided_slice %312 {offsets = [0, 32], sizes = [32, 128], strides = [1, 1]} : vector<32x160xbf16> to vector<32x128xbf16>
    %321 = arith.truncf %319 : vector<2x32xf32> to vector<2x32xbf16>
    %cst_88 = arith.constant dense<0.000000e+00> : vector<2x128xf32>
    %322 = tpu.matmul %321, %320, %cst_88 {dimension_numbers = #tpu.dot_dimension_numbers<[1], [0], [0], [1], [0, 0, 1, 1], [], []>} : vector<2x32xbf16>, vector<32x128xbf16>, vector<2x128xf32> -> vector<2x128xf32>
    %c0_89 = arith.constant 0 : index
    %c0_90 = arith.constant 0 : index
    %323 = vector.load %arg9[%c0_89, %c0_90] : memref<1x128xf32, #tpu.memory_space<vmem>>, vector<1x128xf32>
    %324 = vector.broadcast %323 : vector<1x128xf32> to vector<2x128xf32>
    %325 = arith.addf %322, %324 : vector<2x128xf32>
    %c0_91 = arith.constant 0 : index
    %c0_92 = arith.constant 0 : index
    %326 = vector.load %arg11[%c0_91, %c0_92] : memref<2x128xf32, #tpu.memory_space<vmem>>, vector<2x128xf32>
    tpu.vector_store %arg11[%c0_91, %c0_92], %325 {strides = array<i32>} : memref<2x128xf32, #tpu.memory_space<vmem>>, vector<2x128xf32>,
    return
  }
}

</mosaic_0001>

<bundles_post_ra>
// kernel: tpu_custom_call.1
= control target key start
LH: loop header
LB: loop body
LE: loop exit
PB: predicated region body
PF: predicated region fallthrough
CT: control target
= control target key end

     0   :  { %vm46_vm0 = vcmask 261120   ;;  %s3046_s0 = inlined_call_operand.vmem [shape: bf16[2,8,32], index: 0, kind: input, shape index: {}]   ;;  %s3047_s1 = inlined_call_operand.vmem [shape: f32[2,8], index: 1, kind: input, shape index: {}]   ;;  %s3048_s2 = inlined_call_operand.vmem [shape: f32[3,32], index: 2, kind: input, shape index: {}]   ;;  %s3049_s3 = inlined_call_operand.vmem [shape: bf16[2,32,128], index: 3, kind: input, shape index: {}]   ;;  %s3050_s4 = inlined_call_operand.vmem [shape: bf16[2,32,64], index: 4, kind: input, shape index: {}]   ;;  %s3051_s5 = inlined_call_operand.vmem [shape: bf16[2,64,32], index: 5, kind: input, shape index: {}]   ;;  %s3052_s6 = inlined_call_operand.vmem [shape: f32[2,9,32], index: 6, kind: input, shape index: {}]   ;;  %s3053_s7 = inlined_call_operand.vmem [shape: f32[2,1,64], index: 7, kind: input, shape index: {}]   ;;  %s3054_s8 = inlined_call_operand.vmem [shape: bf16[32,160], index: 8, kind: input, shape index: {}]   ;;  %s3055_s9 = inlined_call_operand.vmem [shape: f32[1,128], index: 9, kind: input, shape index: {}]   ;;  %s3056_s10 = inlined_call_operand.<no memory space> [shape: s32[1], index: 10, kind: input, shape index: {}]   ;;  %s3057_s11 = inlined_call_operand.hbm [shape: f32[2,128], index: 11, kind: output, shape index: {}]  }
   0x1   :  { %v2130_v0 = vld [vmem:[%s3046_s0] sm:$0xff]  }
   0x2   :  { %v2131_v1 = vunpack.c.l.bf16 %v2130_v0  ;;  %v2132_v2 = vunpack.c.h.bf16 %v2130_v0 }
   0x4   :  { %v47_v3 = vsel %vm46_vm0, %v2131_v1, 0.0  ;;  %v50_v4 = vsel %vm46_vm0, %v2132_v2, 0.0 }
   0x5   :  { %48 = vadd.xlane.f32.xlu0 %v47_v3 }
   0x9   :  { %51 = vadd.xlane.f32.xlu0 %v50_v4 }
   0xa   :  { %17 = vsyncpa [#allocation4], 0  ;;  %v2618_v15 = vld [vmem:[%s3049_s3 + $0x8] sm:$0xff]   ;;  %v2539_v16 = vmov 0.0   ;;  %vm2540_vm1 = vmmov 0   ;;  %v2627_v17 = vld [vmem:[%s3049_s3] sm:$0xff]   ;;  %v74_v18 = vlaneseq }
   0xb   :  { %2199 = vmatprep.subr.bf16.mxu0 %v2539_v16  ;;  %2203 = vmatprep.mubr.msk.bf16.mxu0 %vm2540_vm1, %v2539_v16  ;;  %v2643_v21 = vld [vmem:[%s3052_s6] sm:$0xff]  ;;  %s2541_s23 = smov 32   ;;  %s2542_s26 = smov 112   ;;  %vm234_vm2 = vcmask 130048   ;;  %vm446_vm3 = vcmask 64512   ;;  %vm505_vm4 = vcmask 1043456  }
   0xc   :  { %2200 = vmatpush3.bf16.msra.mxu0 %v2618_v15  ;;  %2207 = vmatprep.subr.bf16.mxu1 %v2539_v16  ;;  %v2635_v19 = vshrl.u32 %v74_v18, 7  ;;  %v41_v30 = vld [vmem:[%s3048_s2] sm:$0x7]  ;;  %s2543_s27 = smov 96   ;;  %s2546_s30 = smov 16   ;;  %vm924_vm5 = vcmask 523264  }
   0xd   :  { %2201 = vmatprep.subr.bf16.mxu0 %v2539_v16  ;;  %2209 = vmatprep.mubr.msk.bf16.mxu1 %vm2540_vm1, %v2539_v16  ;;  %vm1914_vm6 = vcmask 1041409   ;;  %vm1995_vm7 = vcmask 785408  }
   0xe   :  { %v2638_v20 = vsub.s32 1, %v2635_v19  ;;  %v2649_v29 = vsub.s32 0, %v2635_v19 }
  0x10   :  { %2202 = vmatpush3.bf16.msra.mxu0 %v2627_v17  ;;  %v182_v22 = vrot.slane %v2643_v21, %v2638_v20  ;;  %v77_v33 = vrot.slane %v41_v30, %v2649_v29  ;;  %v83_v37 = vrot.slane %v41_v30, %v2638_v20  ;;  %v176_v53 = vrot.slane %v2643_v21, %v2649_v29 }
  0x11   :  { %2213 = vmatprep.subr.bf16.mxu0 %v2539_v16 }
  0x1f   :  { %184 = vrot.lane.b32.xlu0 %v182_v22, %s2541_s23  ;;  %v2058_v22 = vld.sshfl [vmem:[%s3047_s1] sm:$0x11 pattern:$0x75316420]  ;;  %s2545_s1 = smov 64  }
  0x8e   :  { %v49_v5 = vpop.xlane.xlu0 %48 }
  0x8f   :  { %v54_v6 = vmul.f32 0.03125, %v49_v5 }
  0x91   :  { %v56_v7 = vsub.f32 %v2131_v1, %v54_v6 }
  0x92   :  { %v52_v8 = vpop.xlane.xlu0 %51 }
  0x93   :  { %v55_v9 = vmul.f32 0.03125, %v52_v8  ;;  %v58_v10 = vmul.f32 %v56_v7, %v56_v7 }
  0x95   :  { %v57_v11 = vsub.f32 %v2132_v2, %v55_v9  ;;  %v60_v12 = vsel %vm46_vm0, %v58_v10, 0.0 }
  0x96   :  { %61 = vadd.xlane.f32.xlu1 %v60_v12  ;;  %v185_v43 = vpop.permute.xlu0 %184  ;;  %v2544_v12 = vmov 1966171168  }
  0x97   :  { %v59_v13 = vmul.f32 %v57_v11, %v57_v11 }
  0x99   :  { %v63_v14 = vsel %vm46_vm0, %v59_v13, 0.0  ;;  %v97_v13 = vunpack.c.l.s4 %v2544_v12 }
  0x9a   :  { %64 = vadd.xlane.f32.xlu1 %v63_v14 }
  0x9b   :  { %v98_v14 = vunpack.c.0.s8 %v97_v13 }
  0x9d   :  { %v101_v18 = vsub.s32 %v98_v14, %v2635_v19 }
 0x11f   :  { %v62_v23 = vpop.xlane.xlu1 %61 }
 0x120   :  { %v66_v24 = vmul.f32 0.03125, %v62_v23  ;;  %v102_v23 = vrot.slane %v2058_v22, %v101_v18 }
 0x122   :  { %v68_v25 = vadd.f32 1e-12, %v66_v24  ;;  %v95_v24 = vcombine.high %v2058_v22, %v2058_v22 }
 0x123   :  { %v65_v26 = vpop.xlane.xlu1 %64 }
 0x124   :  { %2454 = vrsqrt.f32 %v68_v25  ;;  %v67_v27 = vmul.f32 0.03125, %v65_v26  ;;  %v2706_v25 = vrot.slane %v102_v23, %v2649_v29  ;;  %v109_v26 = vrot.slane %v95_v24, %v101_v18 }
 0x126   :  { %v69_v28 = vadd.f32 1e-12, %v67_v27 }
 0x128   :  { %2456 = vrsqrt.f32 %v69_v28 }
 0x131   :  { %v2455_v31 = vpop.eup %2454 }
 0x132   :  { %v72_v32 = vmul.f32 %v2455_v31, %v56_v7 }
 0x134   :  { %v78_v36 = vmul.f32 %v77_v33, %v72_v32  ;;  %v2710_v32 = vrot.slane %v109_v26, %v2649_v29 }
 0x135   :  { %v2457_v34 = vpop.eup %2456 }
 0x136   :  { %v73_v35 = vmul.f32 %v2457_v34, %v57_v11  ;;  %v2656_v39 = vadd.f32 %v83_v37, %v78_v36 }
 0x138   :  { %v79_v38 = vmul.f32 %v77_v33, %v73_v35 }
 0x13a   :  { %v2658_v40 = vadd.f32 %v83_v37, %v79_v38 }
 0x13c   :  { %v116_v41 = vpack.c.bf16 %v2658_v40, %v2656_v39 }
 0x13e   :  { %2204 = vmatmul.mubr.msk.bf16.vlgmr.msra.gmra.mxu0 %vm46_vm0, %v116_v41 }
 0x13f   :  { %2215 = vmatprep.mubr.msk.bf16.mxu0 %vm2540_vm1, %v2539_v16 }
 0x1fe   :  { %v2665_v42 = vpop.f32.mrf.mxu0 }
 0x1ff   :  { %v187_v46 = vadd.f32 %v185_v43, %v2665_v42  ;;  %v177_v60 = vadd.f32 %v176_v53, %v2665_v42 }
 0x200   :  { %v2205_v44 = vpop.f32.mrf.mxu0 }
 0x201   :  { %v227_v50 = vpack.c.bf16 %v187_v46, %v187_v46  ;;  %v223_v1 = vpack.c.bf16 %v177_v60, %v177_v60 }
 0x202   :  { %v2667_v45 = vpop.f32.mrf.mxu0 }
 0x203   :  { %v188_v47 = vadd.f32 %v185_v43, %v2667_v45  ;;  %v178_v56 = vadd.f32 %v176_v53, %v2667_v45 }
 0x204   :  { %v2206_v48 = vpop.f32.mrf.mxu0 }
 0x205   :  { %v2392_v49 = vpack.i.bf16 %v188_v47, %v187_v46  ;;  %v228_v51 = vpack.c.bf16 %v188_v47, %v188_v47  ;;  %v2397_v62 = vpack.i.bf16 %v178_v56, %v177_v60  ;;  %v224_v2 = vpack.c.bf16 %v178_v56, %v178_v56 }
 0x206   :  { %v2716_v47 = vsub.s32 2, %v2635_v19 }
 0x207   :  { %2393 = vrot.lane.b32.xlu1 %v2392_v49, %s2542_s26 }
 0x208   :  { %v192_v48 = vrot.slane %v2643_v21, %v2716_v47 }
 0x20b   :  { %232 = vrot.lane.b32.xlu1 %v227_v50, %s2543_s27 }
 0x20f   :  { %282 = vrot.lane.b32.xlu1 %v228_v51, %s2543_s27 }
 0x279   :  { %v2394_v52 = vpop.permute.xlu1 %2393 }
 0x27a   :  { %v2396_v54 = vunpack.i.h.bf16 %v2394_v52  ;;  %v2395_v55 = vunpack.i.l.bf16 %v2394_v52 }
 0x27c   :  { %v230_v57 = vpack.c.bf16 %v2396_v54, %v2396_v54  ;;  %v229_v58 = vpack.c.bf16 %v2395_v55, %v2395_v55 }
 0x27d   :  { %v233_v59 = vpop.permute.xlu1 %232 }
 0x27e   :  { %331 = vrot.lane.b32.xlu0 %v229_v58, %s2543_s27  ;;  %380 = vrot.lane.b32.xlu1 %v230_v57, %s2543_s27  ;;  %v239_v61 = vsel %vm234_vm2, %v233_v59, 0 }
 0x27f   :  { %2208 = vmatpush3.bf16.xpose.msra.mxu1 %v239_v61 }
 0x280   :  { %2219 = vmatprep.subr.bf16.mxu1 %v2539_v16 }
 0x281   :  { %v283_v63 = vpop.permute.xlu1 %282 }
 0x282   :  { %v288_v0 = vsel %vm234_vm2, %v283_v63, 0  ;;  %2398 = vrot.lane.b32.xlu0 %v2397_v62, %s2542_s26 }
 0x283   :  { %2214 = vmatpush3.bf16.xpose.msra.mxu0 %v288_v0 }
 0x284   :  { %2225 = vmatprep.subr.bf16.mxu0 %v2539_v16 }
 0x286   :  { %2210 = vmatmul.mubr.msk.bf16.vlgmr.msra.gmra.mxu1 %vm234_vm2, %v223_v1 }
 0x287   :  { %2221 = vmatprep.mubr.msk.bf16.mxu1 %vm2540_vm1, %v2539_v16 }
 0x28a   :  { %2216 = vmatmul.mubr.msk.bf16.vlgmr.msra.gmra.mxu0 %vm234_vm2, %v224_v2 }
 0x28b   :  { %2227 = vmatprep.mubr.msk.bf16.mxu0 %vm2540_vm1, %v2539_v16 }
 0x2f0   :  { %v332_v3 = vpop.permute.xlu0 %331  ;;  %v381_v4 = vpop.permute.xlu1 %380 }
 0x2f1   :  { %v337_v5 = vsel %vm234_vm2, %v332_v3, 0  ;;  %v386_v6 = vsel %vm234_vm2, %v381_v4, 0 }
 0x2f2   :  { %2220 = vmatpush3.bf16.xpose.msra.mxu1 %v337_v5  ;;  %2226 = vmatpush3.bf16.xpose.msra.mxu0 %v386_v6 }
 0x2f3   :  { %2231 = vmatprep.subr.bf16.mxu1 %v2539_v16  ;;  %2237 = vmatprep.subr.bf16.mxu0 %v2539_v16 }
 0x2f4   :  { %v2399_v7 = vpop.permute.xlu0 %2398 }
 0x2f5   :  { %v2401_v8 = vunpack.i.h.bf16 %v2399_v7  ;;  %v2400_v9 = vunpack.i.l.bf16 %v2399_v7 }
 0x2f7   :  { %v226_v10 = vpack.c.bf16 %v2401_v8, %v2401_v8  ;;  %v225_v11 = vpack.c.bf16 %v2400_v9, %v2400_v9 }
 0x2f9   :  { %2222 = vmatmul.mubr.msk.bf16.vlgmr.msra.gmra.mxu1 %vm234_vm2, %v225_v11  ;;  %2228 = vmatmul.mubr.msk.bf16.vlgmr.msra.gmra.mxu0 %vm234_vm2, %v226_v10 }
 0x2fa   :  { %2233 = vmatprep.mubr.msk.bf16.mxu1 %vm2540_vm1, %v2539_v16  ;;  %2239 = vmatprep.mubr.msk.bf16.mxu0 %vm2540_vm1, %v2539_v16 }
 0x346   :  { %v275_v27 = vpop.f32.mrf.mxu1 }
 0x347   :  { %v428_v28 = vmul.f32 0.25, %v275_v27 }
 0x348   :  { %v2211_v30 = vpop.f32.mrf.mxu1 }
 0x349   :  { %v442_v31 = vadd.f32 %v2706_v25, %v428_v28 }
 0x34a   :  { %v278_v33 = vpop.f32.mrf.mxu1  ;;  %v324_v34 = vpop.f32.mrf.mxu0 }
 0x34b   :  { %v429_v35 = vmul.f32 0.25, %v324_v34  ;;  %v447_v36 = vsel %vm446_vm3, %v442_v31, -inf }
 0x34c   :  { %v2212_v37 = vpop.f32.mrf.mxu1  ;;  %448 = vmax.xlane.f32.xlu1 %v447_v36  ;;  %v2217_v38 = vpop.f32.mrf.mxu0 }
 0x34d   :  { %v443_v41 = vadd.f32 %v2710_v32, %v429_v35 }
 0x34e   :  { %v327_v43 = vpop.f32.mrf.mxu0 }
 0x34f   :  { %v450_v44 = vsel %vm446_vm3, %v443_v41, -inf }
 0x350   :  { %451 = vmax.xlane.f32.xlu0 %v450_v44  ;;  %v2218_v46 = vpop.f32.mrf.mxu0 }
 0x366   :  { %194 = vrot.lane.b32.xlu0 %v192_v48, %s2545_s1 }
 0x3b9   :  { %v373_v49 = vpop.f32.mrf.mxu1  ;;  %v422_v50 = vpop.f32.mrf.mxu0 }
 0x3ba   :  { %v430_v51 = vmul.f32 0.25, %v373_v49  ;;  %v431_v52 = vmul.f32 0.25, %v422_v50 }
 0x3bb   :  { %v2223_v53 = vpop.f32.mrf.mxu1  ;;  %v2229_v54 = vpop.f32.mrf.mxu0 }
 0x3bc   :  { %v444_v55 = vadd.f32 %v2706_v25, %v430_v51  ;;  %v445_v59 = vadd.f32 %v2710_v32, %v431_v52 }
 0x3bd   :  { %v376_v56 = vpop.f32.mrf.mxu1  ;;  %v425_v57 = vpop.f32.mrf.mxu0 }
 0x3be   :  { %v453_v58 = vsel %vm446_vm3, %v444_v55, -inf  ;;  %v456_v62 = vsel %vm446_vm3, %v445_v59, -inf }
 0x3bf   :  { %454 = vmax.xlane.f32.xlu1 %v453_v58  ;;  %v2224_v60 = vpop.f32.mrf.mxu1  ;;  %v2230_v61 = vpop.f32.mrf.mxu0 }
 0x3c3   :  { %457 = vmax.xlane.f32.xlu1 %v456_v62 }
 0x3d5   :  { %v449_v6 = vpop.xlane.xlu1 %448 }
 0x3d6   :  { %v459_v7 = vsub.f32 %v442_v31, %v449_v6 }
 0x3d8   :  { %v463_v8 = vmul.f32 1.442695, %v459_v7 }
 0x3d9   :  { %v452_v63 = vpop.xlane.xlu0 %451 }
 0x3da   :  { %2458 = vpow2.f32 %v463_v8  ;;  %v460_v9 = vsub.f32 %v443_v41, %v452_v63 }
 0x3dc   :  { %v465_v10 = vmul.f32 1.442695, %v460_v9 }
 0x3dd   :  { %v195_v0 = vpop.permute.xlu0 %194 }
 0x3de   :  { %v197_v1 = vadd.f32 %v195_v0, %v2665_v42  ;;  %v198_v2 = vadd.f32 %v195_v0, %v2667_v45  ;;  %2460 = vpow2.f32 %v465_v10 }
 0x3e0   :  { %v2402_v3 = vpack.i.bf16 %v198_v2, %v197_v1  ;;  %v495_v4 = vpack.c.bf16 %v197_v1, %v197_v1  ;;  %v496_v5 = vpack.c.bf16 %v198_v2, %v198_v2 }
 0x3e2   :  { %500 = vrot.lane.b32.xlu0 %v495_v4, %s2545_s1  ;;  %2403 = vrot.lane.b32.xlu1 %v2402_v3, %s2542_s26 }
 0x3e6   :  { %550 = vrot.lane.b32.xlu1 %v496_v5, %s2545_s1 }
 0x3e7   :  { %v2459_v11 = vpop.eup %2458 }
 0x3e8   :  { %v471_v42 = vsel %vm446_vm3, %v2459_v11, 0.0 }
 0x3eb   :  { %v2461_v45 = vpop.eup %2460 }
 0x3ec   :  { %v474_v12 = vsel %vm446_vm3, %v2461_v45, 0.0 }
 0x401   :  { %472 = vadd.xlane.f32.xlu0 %v471_v42 }
 0x40a   :  { %475 = vadd.xlane.f32.xlu1 %v474_v12 }
 0x448   :  { %v455_v13 = vpop.xlane.xlu1 %454 }
 0x449   :  { %v461_v14 = vsub.f32 %v444_v55, %v455_v13 }
 0x44b   :  { %v467_v18 = vmul.f32 1.442695, %v461_v14 }
 0x44c   :  { %v458_v22 = vpop.xlane.xlu1 %457 }
 0x44d   :  { %2462 = vpow2.f32 %v467_v18  ;;  %v462_v23 = vsub.f32 %v445_v59, %v458_v22 }
 0x44f   :  { %v469_v24 = vmul.f32 1.442695, %v462_v23 }
 0x451   :  { %2464 = vpow2.f32 %v469_v24 }
 0x454   :  { %v501_v26 = vpop.permute.xlu0 %500  ;;  %v2404_v27 = vpop.permute.xlu1 %2403 }
 0x455   :  { %v507_v28 = vsel %vm505_vm4, %v501_v26, 0  ;;  %v2405_v30 = vunpack.i.l.bf16 %v2404_v27  ;;  %v2406_v41 = vunpack.i.h.bf16 %v2404_v27 }
 0x456   :  { %2232 = vmatpush3.bf16.msra.mxu1 %v507_v28 }
 0x457   :  { %v497_v31 = vpack.c.bf16 %v2405_v30, %v2405_v30  ;;  %2243 = vmatprep.subr.bf16.mxu1 %v2539_v16  ;;  %v498_v43 = vpack.c.bf16 %v2406_v41, %v2406_v41 }
 0x458   :  { %v551_v33 = vpop.permute.xlu1 %550 }
 0x459   :  { %v556_v34 = vsel %vm505_vm4, %v551_v33, 0  ;;  %599 = vrot.lane.b32.xlu1 %v497_v31, %s2545_s1  ;;  %v709_v31 = vsub.s32 3, %v2635_v19 }
 0x45a   :  { %v2463_v35 = vpop.eup %2462  ;;  %2238 = vmatpush3.bf16.msra.mxu0 %v556_v34 }
 0x45b   :  { %v477_v36 = vsel %vm446_vm3, %v2463_v35, 0.0  ;;  %2249 = vmatprep.subr.bf16.mxu0 %v2539_v16  ;;  %v710_v33 = vrot.slane %v2643_v21, %v709_v31 }
 0x45c   :  { %478 = vadd.xlane.f32.xlu0 %v477_v36 }
 0x45d   :  { %713 = vrot.lane.b32.xlu1 %v2618_v15, %s2541_s23 }
 0x45e   :  { %v2465_v37 = vpop.eup %2464 }
 0x45f   :  { %v480_v38 = vsel %vm446_vm3, %v2465_v37, 0.0 }
 0x460   :  { %481 = vadd.xlane.f32.xlu0 %v480_v38 }
 0x461   :  { %711 = vrot.lane.b32.xlu1 %v2627_v17, %s2541_s23 }
 0x476   :  { %648 = vrot.lane.b32.xlu0 %v498_v43, %s2545_s1 }
 0x48a   :  { %v473_v44 = vpop.xlane.xlu0 %472 }
 0x48b   :  { %2466 = vrcp.f32 %v473_v44 }
 0x493   :  { %v476_v46 = vpop.xlane.xlu1 %475 }
 0x494   :  { %2468 = vrcp.f32 %v476_v46 }
 0x498   :  { %v2467_v48 = vpop.eup %2466 }
 0x499   :  { %v487_v49 = vmul.f32 %v2467_v48, %v2459_v11 }
 0x49b   :  { %v491_v50 = vpack.c.bf16 %v487_v49, %v487_v49 }
 0x49d   :  { %2234 = vmatmul.mubr.msk.bf16.vlgmr.msra.gmra.mxu1 %vm446_vm3, %v491_v50 }
 0x49e   :  { %2245 = vmatprep.mubr.msk.bf16.mxu1 %vm2540_vm1, %v2539_v16 }
 0x4a1   :  { %v2469_v15 = vpop.eup %2468 }
 0x4a2   :  { %v488_v51 = vmul.f32 %v2469_v15, %v2461_v45 }
 0x4a4   :  { %v492_v52 = vpack.c.bf16 %v488_v51, %v488_v51 }
 0x4a6   :  { %2240 = vmatmul.mubr.msk.bf16.vlgmr.msra.gmra.mxu0 %vm446_vm3, %v492_v52 }
 0x4a7   :  { %2251 = vmatprep.mubr.msk.bf16.mxu0 %vm2540_vm1, %v2539_v16 }
 0x4cb   :  { %v600_v17 = vpop.permute.xlu1 %599 }
 0x4cc   :  { %v605_v53 = vsel %vm505_vm4, %v600_v17, 0 }
 0x4cd   :  { %2244 = vmatpush3.bf16.msra.mxu1 %v605_v53 }
 0x4ce   :  { %2255 = vmatprep.subr.bf16.mxu1 %v2539_v16 }
 0x4cf   :  { %v714_v0 = vpop.permute.xlu1 %713 }
 0x4d3   :  { %v712_v9 = vpop.permute.xlu1 %711 }
 0x4e5   :  { %v479_v54 = vpop.xlane.xlu0 %478 }
 0x4e6   :  { %2470 = vrcp.f32 %v479_v54 }
 0x4e9   :  { %v482_v55 = vpop.xlane.xlu0 %481 }
 0x4ea   :  { %2472 = vrcp.f32 %v482_v55 }
 0x4ed   :  { %v649_v56 = vpop.permute.xlu0 %648 }
 0x4ee   :  { %v654_v57 = vsel %vm505_vm4, %v649_v56, 0  ;;  %v2435_v56 = vld [vmem:[%s3050_s4] sm:$0xff]  }
 0x4ef   :  { %2250 = vmatpush3.bf16.msra.mxu0 %v654_v57 }
 0x4f0   :  { %2263 = vmatprep.subr.bf16.mxu0 %v2539_v16 }
 0x4f3   :  { %v2471_v58 = vpop.eup %2470 }
 0x4f4   :  { %v489_v59 = vmul.f32 %v2471_v58, %v2463_v35 }
 0x4f6   :  { %v493_v60 = vpack.c.bf16 %v489_v59, %v489_v59 }
 0x4f7   :  { %v2473_v61 = vpop.eup %2472 }
 0x4f8   :  { %2246 = vmatmul.mubr.msk.bf16.vlgmr.msra.gmra.mxu1 %vm446_vm3, %v493_v60  ;;  %v490_v62 = vmul.f32 %v2473_v61, %v2465_v37 }
 0x4f9   :  { %2259 = vmatprep.mubr.msk.bf16.mxu1 %vm2540_vm1, %v2539_v16  ;;  %2256 = vmatpush3.bf16.msra.mxu1 %v714_v0 }
 0x4fa   :  { %v494_v63 = vpack.c.bf16 %v490_v62, %v490_v62  ;;  %2257 = vmatprep.subr.bf16.mxu1 %v2539_v16 }
 0x4fc   :  { %2252 = vmatmul.mubr.msk.bf16.vlgmr.msra.gmra.mxu0 %vm446_vm3, %v494_v63  ;;  %v791_v63 = vsub.s32 4, %v2635_v19 }
 0x4fd   :  { %2267 = vmatprep.mubr.msk.bf16.mxu0 %vm2540_vm1, %v2539_v16  ;;  %2258 = vmatpush3.bf16.msra.mxu1 %v712_v9 }
 0x4fe   :  { %2271 = vmatprep.subr.bf16.mxu1 %v2539_v16 }
 0x55d   :  { %v543_v1 = vpop.f32.mrf.mxu1 }
 0x55f   :  { %v2235_v2 = vpop.f32.mrf.mxu1 }
 0x560   :  { %v792_v2 = vrot.slane %v2643_v21, %v791_v63 }
 0x561   :  { %v546_v3 = vpop.f32.mrf.mxu1 }
 0x562   :  { %v797_v3 = vsub.s32 5, %v2635_v19 }
 0x563   :  { %v2236_v4 = vpop.f32.mrf.mxu1 }
 0x566   :  { %v592_v5 = vpop.f32.mrf.mxu0 }
 0x568   :  { %v2241_v6 = vpop.f32.mrf.mxu0 }
 0x56a   :  { %v595_v7 = vpop.f32.mrf.mxu0 }
 0x56b   :  { %v798_v7 = vrot.slane %v2643_v21, %v797_v3 }
 0x56c   :  { %v2242_v8 = vpop.f32.mrf.mxu0 }
 0x5b8   :  { %v641_v10 = vpop.f32.mrf.mxu1 }
 0x5ba   :  { %v2247_v11 = vpop.f32.mrf.mxu1 }
 0x5bc   :  { %v644_v42 = vpop.f32.mrf.mxu1  ;;  %v690_v45 = vpop.f32.mrf.mxu0 }
 0x5bd   :  { %v2407_v12 = vpack.i.bf16 %v690_v45, %v641_v10  ;;  %v2436_v42 = vld [vmem:[%s3051_s5 + $0x18] sm:$0xff]   ;;  %v2437_v45 = vld [vmem:[%s3051_s5 + $0x10] sm:$0xff]  }
 0x5be   :  { %v2248_v13 = vpop.f32.mrf.mxu1  ;;  %v2253_v14 = vpop.f32.mrf.mxu0 }
 0x5bf   :  { %2408 = vrot.lane.b32.xlu0 %v2407_v12, %s2546_s30  ;;  %v2438_v12 = vld [vmem:[%s3051_s5 + $0x8] sm:$0xff]   ;;  %v2439_v13 = vld [vmem:[%s3051_s5] sm:$0xff]  }
 0x5c0   :  { %v693_v18 = vpop.f32.mrf.mxu0  ;;  %v2071_v14 = vld [vmem:[%s3053_s7] ss:$0 sm:$0xff] }
 0x5c2   :  { %v2254_v22 = vpop.f32.mrf.mxu0 }
 0x631   :  { %v2409_v23 = vpop.permute.xlu0 %2408 }
 0x632   :  { %v2411_v24 = vunpack.i.h.bf16 %v2409_v23  ;;  %v2410_v26 = vunpack.i.l.bf16 %v2409_v23 }
 0x634   :  { %v705_v27 = vsel %vm234_vm2, %v592_v5, %v2411_v24  ;;  %v704_v28 = vsel %vm234_vm2, %v543_v1, %v2410_v26 }
 0x635   :  { %v706_v30 = vpack.c.bf16 %v705_v27, %v704_v28 }
 0x637   :  { %2260 = vmatmul.mubr.msk.bf16.vlgmr.msra.gmra.mxu1 %vm46_vm0, %v706_v30 }
 0x638   :  { %2279 = vmatprep.mubr.msk.bf16.mxu1 %vm2540_vm1, %v2539_v16  ;;  %2272 = vmatpush3.bf16.msra.mxu1 %v2436_v42  ;;  %v2836_v42 = vld [vmem:[%s3049_s3 + $0x10] sm:$0xff]  }
 0x639   :  { %2273 = vmatprep.subr.bf16.mxu1 %v2539_v16 }
 0x63c   :  { %2274 = vmatpush3.bf16.msra.mxu1 %v2437_v45  ;;  %v2844_v45 = vld [vmem:[%s3052_s6 + $0x10] sm:$0xff] }
 0x63d   :  { %2275 = vmatprep.subr.bf16.mxu1 %v2539_v16 }
 0x640   :  { %2276 = vmatpush3.bf16.msra.mxu1 %v2438_v12  ;;  %v1083_v12 = vrot.slane %v2844_v45, %v2638_v20 }
 0x641   :  { %2277 = vmatprep.subr.bf16.mxu1 %v2539_v16 }
 0x644   :  { %2278 = vmatpush3.bf16.msra.mxu1 %v2439_v13 }
 0x645   :  { %2297 = vmatprep.subr.bf16.mxu1 %v2539_v16 }
 0x6f7   :  { %v754_v34 = vpop.f32.mrf.mxu1 }
 0x6f8   :  { %v755_v35 = vadd.f32 %v754_v34, %v710_v33 }
 0x6f9   :  { %v2261_v36 = vpop.f32.mrf.mxu1 }
 0x6fa   :  { %v761_v37 = vadd.f32 %v755_v35, %v2656_v39 }
 0x6fb   :  { %v757_v38 = vpop.f32.mrf.mxu1 }
 0x6fc   :  { %v758_v41 = vadd.f32 %v757_v38, %v710_v33  ;;  %v763_v43 = vsel %vm46_vm0, %v761_v37, 0.0 }
 0x6fd   :  { %764 = vadd.xlane.f32.xlu0 %v763_v43  ;;  %v2262_v44 = vpop.f32.mrf.mxu1 }
 0x6fe   :  { %v762_v46 = vadd.f32 %v758_v41, %v2658_v40  ;;  %v2434_v40 = vld [vmem:[%s3050_s4 + $0x8] sm:$0xff]  }
 0x6ff   :  { %2264 = vmatpush3.bf16.msra.mxu0 %v2434_v40 }
 0x700   :  { %v766_v48 = vsel %vm46_vm0, %v762_v46, 0.0  ;;  %2265 = vmatprep.subr.bf16.mxu0 %v2539_v16 }
 0x701   :  { %767 = vadd.xlane.f32.xlu1 %v766_v48 }
 0x703   :  { %2266 = vmatpush3.bf16.msra.mxu0 %v2435_v56 }
 0x704   :  { %2283 = vmatprep.subr.bf16.mxu0 %v2539_v16 }
 0x786   :  { %v765_v49 = vpop.xlane.xlu0 %764 }
 0x787   :  { %v769_v50 = vmul.f32 0.03125, %v765_v49 }
 0x789   :  { %v771_v15 = vsub.f32 %v761_v37, %v769_v50 }
 0x78a   :  { %v768_v51 = vpop.xlane.xlu1 %767 }
 0x78b   :  { %v770_v52 = vmul.f32 0.03125, %v768_v51  ;;  %v773_v17 = vmul.f32 %v771_v15, %v771_v15 }
 0x78d   :  { %v772_v53 = vsub.f32 %v762_v46, %v770_v52  ;;  %v775_v39 = vsel %vm46_vm0, %v773_v17, 0.0 }
 0x78e   :  { %776 = vadd.xlane.f32.xlu0 %v775_v39 }
 0x78f   :  { %v774_v54 = vmul.f32 %v772_v53, %v772_v53 }
 0x791   :  { %v778_v55 = vsel %vm46_vm0, %v774_v54, 0.0 }
 0x792   :  { %779 = vadd.xlane.f32.xlu0 %v778_v55 }
 0x817   :  { %v777_v57 = vpop.xlane.xlu0 %776 }
 0x818   :  { %v781_v58 = vmul.f32 0.03125, %v777_v57 }
 0x81a   :  { %v783_v59 = vadd.f32 1e-12, %v781_v58 }
 0x81b   :  { %v780_v60 = vpop.xlane.xlu0 %779 }
 0x81c   :  { %2474 = vrsqrt.f32 %v783_v59  ;;  %v782_v61 = vmul.f32 0.03125, %v780_v60 }
 0x81e   :  { %v784_v62 = vadd.f32 1e-12, %v782_v61 }
 0x820   :  { %2476 = vrsqrt.f32 %v784_v62 }
 0x829   :  { %v2475_v0 = vpop.eup %2474 }
 0x82a   :  { %v787_v1 = vmul.f32 %v2475_v0, %v771_v15 }
 0x82c   :  { %v793_v6 = vmul.f32 %v792_v2, %v787_v1 }
 0x82d   :  { %v2477_v4 = vpop.eup %2476 }
 0x82e   :  { %v788_v5 = vmul.f32 %v2477_v4, %v772_v53  ;;  %v799_v9 = vadd.f32 %v798_v7, %v793_v6  ;;  %v898_v53 = vsub.s32 6, %v2635_v19 }
 0x830   :  { %v794_v8 = vmul.f32 %v792_v2, %v788_v5  ;;  %v899_v39 = vrot.slane %v2643_v21, %v898_v53 }
 0x832   :  { %v800_v10 = vadd.f32 %v798_v7, %v794_v8 }
 0x834   :  { %v805_v11 = vpack.c.bf16 %v800_v10, %v799_v9 }
 0x836   :  { %2268 = vmatmul.mubr.msk.bf16.vlgmr.msra.gmra.mxu0 %vm46_vm0, %v805_v11 }
 0x837   :  { %2287 = vmatprep.mubr.msk.bf16.mxu0 %vm2540_vm1, %v2539_v16 }
 0x8f6   :  { %v862_v18 = vpop.f32.mrf.mxu0 }
 0x8f7   :  { %v863_v22 = vadd.f32 %v2071_v14, %v862_v18 }
 0x8f8   :  { %v2269_v23 = vpop.f32.mrf.mxu0 }
 0x8f9   :  { %v869_v24 = vmul.f32 %v863_v22, %v863_v22 }
 0x8fa   :  { %v865_v26 = vpop.f32.mrf.mxu0 }
 0x8fb   :  { %v871_v27 = vmul.f32 %v869_v24, %v863_v22  ;;  %v866_v28 = vadd.f32 %v2071_v14, %v865_v26  ;;  %v999_v26 = vsub.s32 7, %v2635_v19 }
 0x8fc   :  { %v2270_v30 = vpop.f32.mrf.mxu0 }
 0x8fd   :  { %v873_v33 = vmul.f32 0.044715, %v871_v27  ;;  %v870_v34 = vmul.f32 %v866_v28, %v866_v28  ;;  %v1000_v30 = vrot.slane %v2643_v21, %v999_v26 }
 0x8ff   :  { %v875_v35 = vadd.f32 %v873_v33, %v863_v22  ;;  %v872_v36 = vmul.f32 %v870_v34, %v866_v28 }
 0x901   :  { %v877_v37 = vmul.f32 0.7978846, %v875_v35  ;;  %v874_v38 = vmul.f32 0.044715, %v872_v36  ;;  %v2080_v35 = vld [vmem:[%s3052_s6 + $0x8] ss:$0 sm:$0xff] }
 0x903   :  { %2478 = vtanh.f32 %v877_v37  ;;  %v876_v41 = vadd.f32 %v874_v38, %v866_v28 }
 0x905   :  { %v878_v43 = vmul.f32 0.7978846, %v876_v41 }
 0x907   :  { %2480 = vtanh.f32 %v878_v43 }
 0x910   :  { %v2479_v44 = vpop.eup %2478 }
 0x911   :  { %v881_v46 = vadd.f32 1.0, %v2479_v44 }
 0x913   :  { %v883_v49 = vmul.f32 0.5, %v881_v46 }
 0x914   :  { %v2481_v48 = vpop.eup %2480 }
 0x915   :  { %v882_v50 = vadd.f32 1.0, %v2481_v48  ;;  %v885_v51 = vmul.f32 %v883_v49, %v863_v22 }
 0x917   :  { %v884_v15 = vmul.f32 0.5, %v882_v50 }
 0x919   :  { %v886_v52 = vmul.f32 %v884_v15, %v866_v28 }
 0x91b   :  { %v895_v17 = vpack.c.bf16 %v886_v52, %v885_v51 }
 0x91d   :  { %2280 = vmatmul.mubr.msk.bf16.vlgmr.msra.gmra.mxu1 %vm924_vm5, %v895_v17 }
 0x91e   :  { %2299 = vmatprep.mubr.msk.bf16.mxu1 %vm2540_vm1, %v2539_v16 }
 0x9dd   :  { %v962_v54 = vpop.f32.mrf.mxu1 }
 0x9de   :  { %v963_v55 = vadd.f32 %v962_v54, %v899_v39 }
 0x9df   :  { %v2281_v40 = vpop.f32.mrf.mxu1 }
 0x9e0   :  { %v969_v56 = vadd.f32 %v963_v55, %v799_v9 }
 0x9e1   :  { %v965_v57 = vpop.f32.mrf.mxu1 }
 0x9e2   :  { %v966_v58 = vadd.f32 %v965_v57, %v899_v39  ;;  %v971_v59 = vsel %vm46_vm0, %v969_v56, 0.0  ;;  %v1077_v39 = vrot.slane %v2844_v45, %v2649_v29 }
 0x9e3   :  { %972 = vadd.xlane.f32.xlu0 %v971_v59  ;;  %v2282_v60 = vpop.f32.mrf.mxu1 }
 0x9e4   :  { %v970_v61 = vadd.f32 %v966_v58, %v800_v10  ;;  %v2830_v10 = vld [vmem:[%s3049_s3 + $0x18] sm:$0xff]  }
 0x9e5   :  { %2284 = vmatpush3.bf16.msra.mxu0 %v2830_v10 }
 0x9e6   :  { %v974_v62 = vsel %vm46_vm0, %v970_v61, 0.0  ;;  %2285 = vmatprep.subr.bf16.mxu0 %v2539_v16 }
 0x9e7   :  { %975 = vadd.xlane.f32.xlu1 %v974_v62 }
 0x9e9   :  { %2286 = vmatpush3.bf16.msra.mxu0 %v2836_v42 }
 0x9ea   :  { %2291 = vmatprep.subr.bf16.mxu0 %v2539_v16 }
 0xa6c   :  { %v973_v0 = vpop.xlane.xlu0 %972 }
 0xa6d   :  { %v977_v1 = vmul.f32 0.03125, %v973_v0 }
 0xa6f   :  { %v979_v2 = vsub.f32 %v969_v56, %v977_v1 }
 0xa70   :  { %v976_v4 = vpop.xlane.xlu1 %975 }
 0xa71   :  { %v978_v5 = vmul.f32 0.03125, %v976_v4  ;;  %v981_v6 = vmul.f32 %v979_v2, %v979_v2 }
 0xa73   :  { %v980_v7 = vsub.f32 %v970_v61, %v978_v5  ;;  %v983_v8 = vsel %vm46_vm0, %v981_v6, 0.0 }
 0xa74   :  { %984 = vadd.xlane.f32.xlu0 %v983_v8 }
 0xa75   :  { %v982_v9 = vmul.f32 %v980_v7, %v980_v7 }
 0xa77   :  { %v986_v11 = vsel %vm46_vm0, %v982_v9, 0.0 }
 0xa78   :  { %987 = vadd.xlane.f32.xlu1 %v986_v11 }
 0xa8a   :  { %1085 = vrot.lane.b32.xlu0 %v1083_v12, %s2541_s23 }
 0xafd   :  { %v985_v13 = vpop.xlane.xlu0 %984 }
 0xafe   :  { %v989_v14 = vmul.f32 0.03125, %v985_v13 }
 0xb00   :  { %v991_v18 = vadd.f32 1e-12, %v989_v14 }
 0xb01   :  { %v988_v22 = vpop.xlane.xlu1 %987  ;;  %v1086_v43 = vpop.permute.xlu0 %1085 }
 0xb02   :  { %2482 = vrsqrt.f32 %v991_v18  ;;  %v990_v23 = vmul.f32 0.03125, %v988_v22 }
 0xb04   :  { %v992_v24 = vadd.f32 1e-12, %v990_v23 }
 0xb06   :  { %2484 = vrsqrt.f32 %v992_v24 }
 0xb0f   :  { %v2483_v27 = vpop.eup %2482 }
 0xb10   :  { %v995_v28 = vmul.f32 %v2483_v27, %v979_v2 }
 0xb12   :  { %v1001_v34 = vmul.f32 %v1000_v30, %v995_v28 }
 0xb13   :  { %v2485_v33 = vpop.eup %2484 }
 0xb14   :  { %v996_v20 = vmul.f32 %v2485_v33, %v980_v7  ;;  %v2856_v37 = vadd.f32 %v2080_v35, %v1001_v34 }
 0xb16   :  { %v1002_v36 = vmul.f32 %v1000_v30, %v996_v20 }
 0xb18   :  { %v2858_v38 = vadd.f32 %v2080_v35, %v1002_v36 }
 0xb1a   :  { %v1017_v41 = vpack.c.bf16 %v2858_v38, %v2856_v37 }
 0xb1c   :  { %2288 = vmatmul.mubr.msk.bf16.vlgmr.msra.gmra.mxu0 %vm46_vm0, %v1017_v41  ;;  %v1093_v41 = vrot.slane %v2844_v45, %v2716_v47 }
 0xb1d   :  { %2293 = vmatprep.mubr.msk.bf16.mxu0 %vm2540_vm1, %v2539_v16 }
 0xbdc   :  { %v2865_v21 = vpop.f32.mrf.mxu0 }
 0xbdd   :  { %v1088_v48 = vadd.f32 %v1086_v43, %v2865_v21  ;;  %v1078_v59 = vadd.f32 %v1077_v39, %v2865_v21 }
 0xbde   :  { %v2289_v44 = vpop.f32.mrf.mxu0 }
 0xbdf   :  { %v1128_v51 = vpack.c.bf16 %v1088_v48, %v1088_v48  ;;  %v1124_v0 = vpack.c.bf16 %v1078_v59, %v1078_v59 }
 0xbe0   :  { %v2867_v46 = vpop.f32.mrf.mxu0 }
 0xbe1   :  { %v1089_v49 = vadd.f32 %v1086_v43, %v2867_v46  ;;  %v1079_v40 = vadd.f32 %v1077_v39, %v2867_v46 }
 0xbe2   :  { %v2290_v50 = vpop.f32.mrf.mxu0 }
 0xbe3   :  { %v2412_v15 = vpack.i.bf16 %v1089_v49, %v1088_v48  ;;  %v1129_v52 = vpack.c.bf16 %v1089_v49, %v1089_v49  ;;  %v2417_v61 = vpack.i.bf16 %v1079_v40, %v1078_v59  ;;  %v1125_v1 = vpack.c.bf16 %v1079_v40, %v1079_v40 }
 0xbe5   :  { %2413 = vrot.lane.b32.xlu1 %v2412_v15, %s2542_s26 }
 0xbe9   :  { %1133 = vrot.lane.b32.xlu1 %v1128_v51, %s2543_s27 }
 0xbed   :  { %1182 = vrot.lane.b32.xlu1 %v1129_v52, %s2543_s27 }
 0xc57   :  { %v2414_v17 = vpop.permute.xlu1 %2413 }
 0xc58   :  { %v2416_v54 = vunpack.i.h.bf16 %v2414_v17  ;;  %v2415_v55 = vunpack.i.l.bf16 %v2414_v17 }
 0xc5a   :  { %v1131_v56 = vpack.c.bf16 %v2416_v54, %v2416_v54  ;;  %v1130_v57 = vpack.c.bf16 %v2415_v55, %v2415_v55 }
 0xc5b   :  { %v1134_v58 = vpop.permute.xlu1 %1133 }
 0xc5c   :  { %v1139_v60 = vsel %vm234_vm2, %v1134_v58, 0  ;;  %1231 = vrot.lane.b32.xlu0 %v1130_v57, %s2543_s27  ;;  %1280 = vrot.lane.b32.xlu1 %v1131_v56, %s2543_s27 }
 0xc5d   :  { %2292 = vmatpush3.bf16.xpose.msra.mxu0 %v1139_v60 }
 0xc5e   :  { %2303 = vmatprep.subr.bf16.mxu0 %v2539_v16 }
 0xc5f   :  { %v1183_v29 = vpop.permute.xlu1 %1182 }
 0xc60   :  { %v1188_v62 = vsel %vm234_vm2, %v1183_v29, 0  ;;  %2418 = vrot.lane.b32.xlu0 %v2417_v61, %s2542_s26 }
 0xc61   :  { %2298 = vmatpush3.bf16.xpose.msra.mxu1 %v1188_v62 }
 0xc62   :  { %2309 = vmatprep.subr.bf16.mxu1 %v2539_v16 }
 0xc64   :  { %2294 = vmatmul.mubr.msk.bf16.vlgmr.msra.gmra.mxu0 %vm234_vm2, %v1124_v0 }
 0xc65   :  { %2305 = vmatprep.mubr.msk.bf16.mxu0 %vm2540_vm1, %v2539_v16 }
 0xc68   :  { %2300 = vmatmul.mubr.msk.bf16.vlgmr.msra.gmra.mxu1 %vm234_vm2, %v1125_v1 }
 0xc69   :  { %2311 = vmatprep.mubr.msk.bf16.mxu1 %vm2540_vm1, %v2539_v16 }
 0xcce   :  { %v1232_v2 = vpop.permute.xlu0 %1231  ;;  %v1281_v4 = vpop.permute.xlu1 %1280 }
 0xccf   :  { %v1237_v5 = vsel %vm234_vm2, %v1232_v2, 0  ;;  %v1286_v6 = vsel %vm234_vm2, %v1281_v4, 0 }
 0xcd0   :  { %2304 = vmatpush3.bf16.xpose.msra.mxu0 %v1237_v5  ;;  %2310 = vmatpush3.bf16.xpose.msra.mxu1 %v1286_v6 }
 0xcd1   :  { %2315 = vmatprep.subr.bf16.mxu0 %v2539_v16  ;;  %2321 = vmatprep.subr.bf16.mxu1 %v2539_v16 }
 0xcd2   :  { %v2419_v7 = vpop.permute.xlu0 %2418 }
 0xcd3   :  { %v2421_v8 = vunpack.i.h.bf16 %v2419_v7  ;;  %v2420_v9 = vunpack.i.l.bf16 %v2419_v7 }
 0xcd5   :  { %v1127_v11 = vpack.c.bf16 %v2421_v8, %v2421_v8  ;;  %v1126_v12 = vpack.c.bf16 %v2420_v9, %v2420_v9 }
 0xcd7   :  { %2306 = vmatmul.mubr.msk.bf16.vlgmr.msra.gmra.mxu0 %vm234_vm2, %v1126_v12  ;;  %2312 = vmatmul.mubr.msk.bf16.vlgmr.msra.gmra.mxu1 %vm234_vm2, %v1127_v11 }
 0xcd8   :  { %2317 = vmatprep.mubr.msk.bf16.mxu0 %vm2540_vm1, %v2539_v16  ;;  %2323 = vmatprep.mubr.msk.bf16.mxu1 %vm2540_vm1, %v2539_v16 }
 0xd24   :  { %v1175_v13 = vpop.f32.mrf.mxu0 }
 0xd25   :  { %v1328_v14 = vmul.f32 0.25, %v1175_v13 }
 0xd26   :  { %v2295_v18 = vpop.f32.mrf.mxu0 }
 0xd27   :  { %v1332_v22 = vadd.f32 %v1328_v14, %v2706_v25 }
 0xd28   :  { %v1178_v23 = vpop.f32.mrf.mxu0  ;;  %v1224_v24 = vpop.f32.mrf.mxu1 }
 0xd29   :  { %v1329_v27 = vmul.f32 0.25, %v1224_v24  ;;  %v1336_v28 = vsel %vm446_vm3, %v1332_v22, -inf }
 0xd2a   :  { %v2301_v30 = vpop.f32.mrf.mxu1  ;;  %1337 = vmax.xlane.f32.xlu1 %v1336_v28  ;;  %v2296_v33 = vpop.f32.mrf.mxu0 }
 0xd2b   :  { %v1333_v20 = vadd.f32 %v1329_v27, %v2710_v32 }
 0xd2c   :  { %v1227_v34 = vpop.f32.mrf.mxu1 }
 0xd2d   :  { %v1339_v35 = vsel %vm446_vm3, %v1333_v20, -inf }
 0xd2e   :  { %1340 = vmax.xlane.f32.xlu0 %v1339_v35  ;;  %v2302_v36 = vpop.f32.mrf.mxu1 }
 0xd44   :  { %1095 = vrot.lane.b32.xlu0 %v1093_v41, %s2545_s1 }
 0xd97   :  { %v1273_v43 = vpop.f32.mrf.mxu0  ;;  %v1322_v44 = vpop.f32.mrf.mxu1 }
 0xd98   :  { %v1330_v48 = vmul.f32 0.25, %v1273_v43  ;;  %v1331_v49 = vmul.f32 0.25, %v1322_v44 }
 0xd99   :  { %v2307_v50 = vpop.f32.mrf.mxu0  ;;  %v2313_v15 = vpop.f32.mrf.mxu1 }
 0xd9a   :  { %v1334_v51 = vadd.f32 %v1330_v48, %v2706_v25  ;;  %v1335_v54 = vadd.f32 %v1331_v49, %v2710_v32 }
 0xd9b   :  { %v1276_v52 = vpop.f32.mrf.mxu0  ;;  %v1325_v17 = vpop.f32.mrf.mxu1 }
 0xd9c   :  { %v1342_v39 = vsel %vm446_vm3, %v1334_v51, -inf  ;;  %v1345_v56 = vsel %vm446_vm3, %v1335_v54, -inf }
 0xd9d   :  { %v2314_v55 = vpop.f32.mrf.mxu1  ;;  %1343 = vmax.xlane.f32.xlu1 %v1342_v39  ;;  %v2308_v40 = vpop.f32.mrf.mxu0 }
 0xda1   :  { %1346 = vmax.xlane.f32.xlu1 %v1345_v56 }
 0xdb3   :  { %v1338_v32 = vpop.xlane.xlu1 %1337 }
 0xdb4   :  { %v1348_v62 = vsub.f32 %v1332_v22, %v1338_v32 }
 0xdb6   :  { %v1352_v0 = vmul.f32 1.442695, %v1348_v62 }
 0xdb7   :  { %v1341_v57 = vpop.xlane.xlu0 %1340 }
 0xdb8   :  { %2486 = vpow2.f32 %v1352_v0  ;;  %v1349_v1 = vsub.f32 %v1333_v20, %v1341_v57 }
 0xdba   :  { %v1354_v2 = vmul.f32 1.442695, %v1349_v1 }
 0xdbb   :  { %v1096_v58 = vpop.permute.xlu0 %1095 }
 0xdbc   :  { %v1098_v59 = vadd.f32 %v1096_v58, %v2865_v21  ;;  %v1099_v60 = vadd.f32 %v1096_v58, %v2867_v46  ;;  %2488 = vpow2.f32 %v1354_v2 }
 0xdbe   :  { %v2422_v61 = vpack.i.bf16 %v1099_v60, %v1098_v59  ;;  %v1384_v25 = vpack.c.bf16 %v1098_v59, %v1098_v59  ;;  %v1385_v29 = vpack.c.bf16 %v1099_v60, %v1099_v60 }
 0xdc0   :  { %1389 = vrot.lane.b32.xlu0 %v1384_v25, %s2545_s1  ;;  %2423 = vrot.lane.b32.xlu1 %v2422_v61, %s2542_s26 }
 0xdc4   :  { %1438 = vrot.lane.b32.xlu1 %v1385_v29, %s2545_s1 }
 0xdc5   :  { %v2487_v4 = vpop.eup %2486 }
 0xdc6   :  { %v1360_v21 = vsel %vm446_vm3, %v2487_v4, 0.0 }
 0xdc9   :  { %v2489_v46 = vpop.eup %2488 }
 0xdca   :  { %v1363_v5 = vsel %vm446_vm3, %v2489_v46, 0.0 }
 0xddf   :  { %1361 = vadd.xlane.f32.xlu0 %v1360_v21 }
 0xde8   :  { %1364 = vadd.xlane.f32.xlu1 %v1363_v5 }
 0xe26   :  { %v1344_v6 = vpop.xlane.xlu1 %1343 }
 0xe27   :  { %v1350_v7 = vsub.f32 %v1334_v51, %v1344_v6 }
 0xe29   :  { %v1356_v8 = vmul.f32 1.442695, %v1350_v7 }
 0xe2a   :  { %v1347_v9 = vpop.xlane.xlu1 %1346 }
 0xe2b   :  { %2490 = vpow2.f32 %v1356_v8  ;;  %v1351_v11 = vsub.f32 %v1335_v54, %v1347_v9 }
 0xe2d   :  { %v1358_v12 = vmul.f32 1.442695, %v1351_v11 }
 0xe2f   :  { %2492 = vpow2.f32 %v1358_v12 }
 0xe32   :  { %v1390_v13 = vpop.permute.xlu0 %1389  ;;  %v2424_v14 = vpop.permute.xlu1 %2423 }
 0xe33   :  { %v1395_v18 = vsel %vm505_vm4, %v1390_v13, 0  ;;  %v2425_v22 = vunpack.i.l.bf16 %v2424_v14  ;;  %v2426_v34 = vunpack.i.h.bf16 %v2424_v14 }
 0xe34   :  { %2316 = vmatpush3.bf16.msra.mxu0 %v1395_v18 }
 0xe35   :  { %v1386_v23 = vpack.c.bf16 %v2425_v22, %v2425_v22  ;;  %2327 = vmatprep.subr.bf16.mxu0 %v2539_v16  ;;  %v1387_v35 = vpack.c.bf16 %v2426_v34, %v2426_v34 }
 0xe36   :  { %v1439_v24 = vpop.permute.xlu1 %1438 }
 0xe37   :  { %v1444_v27 = vsel %vm505_vm4, %v1439_v24, 0  ;;  %1487 = vrot.lane.b32.xlu1 %v1386_v23, %s2545_s1  ;;  %v1598_v24 = vrot.slane %v2844_v45, %v709_v31 }
 0xe38   :  { %v2491_v28 = vpop.eup %2490  ;;  %2322 = vmatpush3.bf16.msra.mxu1 %v1444_v27 }
 0xe39   :  { %v1366_v30 = vsel %vm446_vm3, %v2491_v28, 0.0  ;;  %2333 = vmatprep.subr.bf16.mxu1 %v2539_v16 }
 0xe3a   :  { %1367 = vadd.xlane.f32.xlu0 %v1366_v30 }
 0xe3b   :  { %1601 = vrot.lane.b32.xlu1 %v2830_v10, %s2541_s23 }
 0xe3c   :  { %v2493_v33 = vpop.eup %2492 }
 0xe3d   :  { %v1369_v20 = vsel %vm446_vm3, %v2493_v33, 0.0 }
 0xe3e   :  { %1370 = vadd.xlane.f32.xlu0 %v1369_v20 }
 0xe3f   :  { %1599 = vrot.lane.b32.xlu1 %v2836_v42, %s2541_s23  ;;  %s2547_s23 = smov [#allocation3]  }
 0xe40   :  { %s2050_s26 = sshll.u32 %s2547_s23, 4  ;;  %s2051_s26 = int_to_ptr.vmem [resolvable:$true] %s2050_s26 }
 0xe41   :  { %p2522_p1 = scmp.lt.s32.totalorder %s2051_s26, %s2051_s26 }
 0xe54   :  { %1536 = vrot.lane.b32.xlu0 %v1387_v35, %s2545_s1 }
 0xe68   :  { %v1362_v36 = vpop.xlane.xlu0 %1361 }
 0xe69   :  { %2494 = vrcp.f32 %v1362_v36 }
 0xe71   :  { %v1365_v41 = vpop.xlane.xlu1 %1364 }
 0xe72   :  { %2496 = vrcp.f32 %v1365_v41 }
 0xe76   :  { %v2495_v43 = vpop.eup %2494 }
 0xe77   :  { %v1376_v44 = vmul.f32 %v2495_v43, %v2487_v4 }
 0xe79   :  { %v1380_v48 = vpack.c.bf16 %v1376_v44, %v1376_v44 }
 0xe7b   :  { %2318 = vmatmul.mubr.msk.bf16.vlgmr.msra.gmra.mxu0 %vm446_vm3, %v1380_v48 }
 0xe7c   :  { %2329 = vmatprep.mubr.msk.bf16.mxu0 %vm2540_vm1, %v2539_v16 }
 0xe7f   :  { %v2497_v10 = vpop.eup %2496 }
 0xe80   :  { %v1377_v49 = vmul.f32 %v2497_v10, %v2489_v46 }
 0xe82   :  { %v1381_v50 = vpack.c.bf16 %v1377_v49, %v1377_v49 }
 0xe84   :  { %2324 = vmatmul.mubr.msk.bf16.vlgmr.msra.gmra.mxu1 %vm446_vm3, %v1381_v50 }
 0xe85   :  { %2335 = vmatprep.mubr.msk.bf16.mxu1 %vm2540_vm1, %v2539_v16 }
 0xea9   :  { %v1488_v42 = vpop.permute.xlu1 %1487 }
 0xeaa   :  { %v1493_v15 = vsel %vm505_vm4, %v1488_v42, 0 }
 0xeab   :  { %2328 = vmatpush3.bf16.msra.mxu0 %v1493_v15 }
 0xeac   :  { %2339 = vmatprep.subr.bf16.mxu0 %v2539_v16 }
 0xead   :  { %v1602_v59 = vpop.permute.xlu1 %1601 }
 0xeb1   :  { %v1600_v2 = vpop.permute.xlu1 %1599 }
 0xec3   :  { %v1368_v51 = vpop.xlane.xlu0 %1367 }
 0xec4   :  { %2498 = vrcp.f32 %v1368_v51 }
 0xec7   :  { %v1371_v52 = vpop.xlane.xlu0 %1370 }
 0xec8   :  { %2500 = vrcp.f32 %v1371_v52  ;;  %v2443_v52 = vld [vmem:[%s3050_s4 + $0x10] sm:$0xff]  }
 0xecb   :  { %v1537_v17 = vpop.permute.xlu0 %1536 }
 0xecc   :  { %v1542_v39 = vsel %vm505_vm4, %v1537_v17, 0 }
 0xecd   :  { %2334 = vmatpush3.bf16.msra.mxu1 %v1542_v39 }
 0xece   :  { %2347 = vmatprep.subr.bf16.mxu1 %v2539_v16 }
 0xed1   :  { %v2499_v54 = vpop.eup %2498 }
 0xed2   :  { %v1378_v55 = vmul.f32 %v2499_v54, %v2491_v28 }
 0xed4   :  { %v1382_v40 = vpack.c.bf16 %v1378_v55, %v1378_v55 }
 0xed5   :  { %v2501_v56 = vpop.eup %2500 }
 0xed6   :  { %2330 = vmatmul.mubr.msk.bf16.vlgmr.msra.gmra.mxu0 %vm446_vm3, %v1382_v40  ;;  %v1379_v57 = vmul.f32 %v2501_v56, %v2493_v33 }
 0xed7   :  { %2343 = vmatprep.mubr.msk.bf16.mxu0 %vm2540_vm1, %v2539_v16  ;;  %2340 = vmatpush3.bf16.msra.mxu0 %v1602_v59  ;;  %v1680_v59 = vrot.slane %v2844_v45, %v791_v63  ;;  %v2444_v63 = vld [vmem:[%s3051_s5 + $0x38] sm:$0xff]  }
 0xed8   :  { %v1383_v58 = vpack.c.bf16 %v1379_v57, %v1379_v57  ;;  %2341 = vmatprep.subr.bf16.mxu0 %v2539_v16 }
 0xeda   :  { %2336 = vmatmul.mubr.msk.bf16.vlgmr.msra.gmra.mxu1 %vm446_vm3, %v1383_v58 }
 0xedb   :  { %2351 = vmatprep.mubr.msk.bf16.mxu1 %vm2540_vm1, %v2539_v16  ;;  %2342 = vmatpush3.bf16.msra.mxu0 %v1600_v2  ;;  %v2446_v2 = vld [vmem:[%s3051_s5 + $0x28] sm:$0xff]  }
 0xedc   :  { %2355 = vmatprep.subr.bf16.mxu0 %v2539_v16 }
 0xf3b   :  { %v1431_v60 = vpop.f32.mrf.mxu0 }
 0xf3d   :  { %v2319_v61 = vpop.f32.mrf.mxu0 }
 0xf3f   :  { %v1434_v25 = vpop.f32.mrf.mxu0 }
 0xf41   :  { %v2320_v29 = vpop.f32.mrf.mxu0 }
 0xf42   :  { %v1686_v29 = vrot.slane %v2844_v45, %v797_v3  ;;  %v2445_v3 = vld [vmem:[%s3051_s5 + $0x30] sm:$0xff]  }
 0xf44   :  { %v1480_v32 = vpop.f32.mrf.mxu1 }
 0xf46   :  { %v2325_v62 = vpop.f32.mrf.mxu1 }
 0xf48   :  { %v1483_v0 = vpop.f32.mrf.mxu1 }
 0xf4a   :  { %v2326_v1 = vpop.f32.mrf.mxu1 }
 0xf96   :  { %v1529_v4 = vpop.f32.mrf.mxu0 }
 0xf98   :  { %v2331_v21 = vpop.f32.mrf.mxu0 }
 0xf99   :  { %v2104_v21 = vld [vmem:[%s3053_s7 + $0x1] ss:$0 sm:$0xff] }
 0xf9a   :  { %v1532_v46 = vpop.f32.mrf.mxu0  ;;  %v1578_v5 = vpop.f32.mrf.mxu1 }
 0xf9b   :  { %v2427_v6 = vpack.i.bf16 %v1578_v5, %v1529_v4  ;;  %v2447_v4 = vld [vmem:[%s3051_s5 + $0x20] sm:$0xff]  }
 0xf9c   :  { %v2332_v7 = vpop.f32.mrf.mxu0  ;;  %v2337_v8 = vpop.f32.mrf.mxu1 }
 0xf9d   :  { %2428 = vrot.lane.b32.xlu0 %v2427_v6, %s2546_s30 }
 0xf9e   :  { %v1581_v9 = vpop.f32.mrf.mxu1 }
 0xfa0   :  { %v2338_v11 = vpop.f32.mrf.mxu1 }
0x100f   :  { %v2429_v12 = vpop.permute.xlu0 %2428 }
0x1010   :  { %v2431_v13 = vunpack.i.h.bf16 %v2429_v12  ;;  %v2430_v14 = vunpack.i.l.bf16 %v2429_v12 }
0x1012   :  { %v1593_v18 = vsel %vm234_vm2, %v1480_v32, %v2431_v13  ;;  %v1592_v22 = vsel %vm234_vm2, %v1431_v60, %v2430_v14 }
0x1013   :  { %v1594_v23 = vpack.c.bf16 %v1593_v18, %v1592_v22 }
0x1015   :  { %2344 = vmatmul.mubr.msk.bf16.vlgmr.msra.gmra.mxu0 %vm46_vm0, %v1594_v23 }
0x1016   :  { %2363 = vmatprep.mubr.msk.bf16.mxu0 %vm2540_vm1, %v2539_v16  ;;  %2356 = vmatpush3.bf16.msra.mxu0 %v2444_v63 }
0x1017   :  { %2357 = vmatprep.subr.bf16.mxu0 %v2539_v16 }
0x101a   :  { %2358 = vmatpush3.bf16.msra.mxu0 %v2445_v3 }
0x101b   :  { %2359 = vmatprep.subr.bf16.mxu0 %v2539_v16 }
0x101e   :  { %2360 = vmatpush3.bf16.msra.mxu0 %v2446_v2  ;;  %v1890_v2 = vrot.slane %v2844_v45, %v999_v26 }
0x101f   :  { %2361 = vmatprep.subr.bf16.mxu0 %v2539_v16 }
0x1022   :  { %2362 = vmatpush3.bf16.msra.mxu0 %v2447_v4 }
0x10d5   :  { %v1642_v27 = vpop.f32.mrf.mxu0 }
0x10d6   :  { %v1643_v28 = vadd.f32 %v1642_v27, %v1598_v24 }
0x10d7   :  { %v2345_v30 = vpop.f32.mrf.mxu0 }
0x10d8   :  { %v1649_v33 = vadd.f32 %v1643_v28, %v2856_v37 }
0x10d9   :  { %v1645_v20 = vpop.f32.mrf.mxu0 }
0x10da   :  { %v1646_v34 = vadd.f32 %v1645_v20, %v1598_v24  ;;  %v1651_v35 = vsel %vm46_vm0, %v1649_v33, 0.0 }
0x10db   :  { %1652 = vadd.xlane.f32.xlu0 %v1651_v35  ;;  %v2346_v36 = vpop.f32.mrf.mxu0 }
0x10dc   :  { %v1650_v41 = vadd.f32 %v1646_v34, %v2858_v38  ;;  %v2442_v38 = vld [vmem:[%s3050_s4 + $0x18] sm:$0xff]  }
0x10dd   :  { %2348 = vmatpush3.bf16.msra.mxu1 %v2442_v38 }
0x10de   :  { %v1654_v43 = vsel %vm46_vm0, %v1650_v41, 0.0  ;;  %2349 = vmatprep.subr.bf16.mxu1 %v2539_v16 }
0x10df   :  { %1655 = vadd.xlane.f32.xlu1 %v1654_v43 }
0x10e1   :  { %2350 = vmatpush3.bf16.msra.mxu1 %v2443_v52 }
0x10e2   :  { %2367 = vmatprep.subr.bf16.mxu1 %v2539_v16 }
0x1164   :  { %v1653_v44 = vpop.xlane.xlu0 %1652 }
0x1165   :  { %v1657_v48 = vmul.f32 0.03125, %v1653_v44 }
0x1167   :  { %v1659_v10 = vsub.f32 %v1649_v33, %v1657_v48  ;;  %v1790_v48 = vrot.slane %v2844_v45, %v898_v53 }
0x1168   :  { %v1656_v31 = vpop.xlane.xlu1 %1655 }
0x1169   :  { %v1658_v49 = vmul.f32 0.03125, %v1656_v31  ;;  %v1661_v50 = vmul.f32 %v1659_v10, %v1659_v10 }
0x116b   :  { %v1660_v42 = vsub.f32 %v1650_v41, %v1658_v49  ;;  %v1663_v37 = vsel %vm46_vm0, %v1661_v50, 0.0 }
0x116c   :  { %1664 = vadd.xlane.f32.xlu0 %v1663_v37 }
0x116d   :  { %v1662_v15 = vmul.f32 %v1660_v42, %v1660_v42 }
0x116f   :  { %v1666_v51 = vsel %vm46_vm0, %v1662_v15, 0.0 }
0x1170   :  { %1667 = vadd.xlane.f32.xlu0 %v1666_v51 }
0x11f5   :  { %v1665_v17 = vpop.xlane.xlu0 %1664 }
0x11f6   :  { %v1669_v39 = vmul.f32 0.03125, %v1665_v17 }
0x11f8   :  { %v1671_v54 = vadd.f32 1e-12, %v1669_v39 }
0x11f9   :  { %v1668_v55 = vpop.xlane.xlu0 %1667 }
0x11fa   :  { %2502 = vrsqrt.f32 %v1671_v54  ;;  %v1670_v40 = vmul.f32 0.03125, %v1668_v55 }
0x11fc   :  { %v1672_v56 = vadd.f32 1e-12, %v1670_v40 }
0x11fe   :  { %2504 = vrsqrt.f32 %v1672_v56 }
0x1207   :  { %v2503_v57 = vpop.eup %2502 }
0x1208   :  { %v1675_v58 = vmul.f32 %v2503_v57, %v1659_v10 }
0x120a   :  { %v1681_v25 = vmul.f32 %v1680_v59, %v1675_v58 }
0x120b   :  { %v2505_v60 = vpop.eup %2504 }
0x120c   :  { %v1676_v61 = vmul.f32 %v2505_v60, %v1660_v42  ;;  %v1687_v62 = vadd.f32 %v1686_v29, %v1681_v25  ;;  %v2448_v60 = vld [vmem:[%s3054_s8 + $0x10] ss:$8 sps:$4 sm:$0xff]   ;;  %v2452_v25 = vld [vmem:[%s3054_s8 + $0x14] ss:$8 sps:$4 sm:$0xff]  }
0x120e   :  { %v1682_v32 = vmul.f32 %v1680_v59, %v1676_v61  ;;  %v2450_v61 = vld [vmem:[%s3054_s8] ss:$8 sps:$4 sm:$0xff]  }
0x1210   :  { %v1688_v0 = vadd.f32 %v1686_v29, %v1682_v32  ;;  %v2453_v29 = vld [vmem:[%s3054_s8 + $0x4] ss:$8 sps:$4 sm:$0xff]  }
0x1212   :  { %v1694_v1 = vpack.c.bf16 %v1688_v0, %v1687_v62 }
0x1214   :  { %2352 = vmatmul.mubr.msk.bf16.vlgmr.msra.gmra.mxu1 %vm46_vm0, %v1694_v1 }
0x1215   :  { %2371 = vmatprep.mubr.msk.bf16.mxu1 %vm2540_vm1, %v2539_v16  ;;  %2368 = vmatpush3.bf16.msra.mxu1 %v2448_v60 }
0x1216   :  { %2369 = vmatprep.subr.bf16.mxu1 %v2539_v16 }
0x1219   :  { %2370 = vmatpush3.bf16.msra.mxu1 %v2450_v61 }
0x121a   :  { %2375 = vmatprep.subr.bf16.mxu1 %v2539_v16 }
0x12d4   :  { %v1752_v46 = vpop.f32.mrf.mxu1 }
0x12d5   :  { %v1753_v5 = vadd.f32 %v2104_v21, %v1752_v46 }
0x12d6   :  { %v2353_v6 = vpop.f32.mrf.mxu1 }
0x12d7   :  { %v1759_v7 = vmul.f32 %v1753_v5, %v1753_v5  ;;  %v2121_v6 = vld [vmem:[%s3052_s6 + $0x18] ss:$0 sm:$0xff] }
0x12d8   :  { %v1755_v8 = vpop.f32.mrf.mxu1 }
0x12d9   :  { %v1761_v9 = vmul.f32 %v1759_v7, %v1753_v5  ;;  %v1756_v11 = vadd.f32 %v2104_v21, %v1755_v8 }
0x12da   :  { %v2354_v12 = vpop.f32.mrf.mxu1 }
0x12db   :  { %v1763_v13 = vmul.f32 0.044715, %v1761_v9  ;;  %v1760_v14 = vmul.f32 %v1756_v11, %v1756_v11 }
0x12dd   :  { %v1765_v18 = vadd.f32 %v1763_v13, %v1753_v5  ;;  %v1762_v22 = vmul.f32 %v1760_v14, %v1756_v11 }
0x12df   :  { %v1767_v23 = vmul.f32 0.7978846, %v1765_v18  ;;  %v1764_v24 = vmul.f32 0.044715, %v1762_v22 }
0x12e1   :  { %2506 = vtanh.f32 %v1767_v23  ;;  %v1766_v27 = vadd.f32 %v1764_v24, %v1756_v11 }
0x12e3   :  { %v1768_v28 = vmul.f32 0.7978846, %v1766_v27 }
0x12e5   :  { %2508 = vtanh.f32 %v1768_v28 }
0x12ee   :  { %v2507_v30 = vpop.eup %2506 }
0x12ef   :  { %v1771_v33 = vadd.f32 1.0, %v2507_v30 }
0x12f1   :  { %v1773_v34 = vmul.f32 0.5, %v1771_v33  ;;  %v2516_v33 = vld [vmem:[%s3048_s2] sm:$0x7]  ;;  %s2517_s2 = scalar_lea.vmem %s2051_s26, 32 }
0x12f2   :  { %v2509_v20 = vpop.eup %2508  ;;  %p2518_p0 = scmp.ne.s32.totalorder %s2051_s26, %s2517_s2  ;;  %p2523_p2 = scmp.lt.s32.totalorder %s2517_s2, %s2517_s2 }
0x12f3   :  { %v1772_v35 = vadd.f32 1.0, %v2509_v20  ;;  %v1775_v41 = vmul.f32 %v1773_v34, %v1753_v5  ;;  %v1908_v20 = vrot.slane %v2516_v33, %v2716_v47 }
0x12f4   :  { %p2524_p3 = por %p2523_p2, %p2522_p1 }
0x12f5   :  { %v1774_v36 = vmul.f32 0.5, %v1772_v35 }
0x12f6   :  { %p2525_p4 = pnand %p2524_p3, %p2518_p0 }
0x12f7   :  { %v1776_v43 = vmul.f32 %v1774_v36, %v1756_v11 }
0x12f9   :  { %v1786_v44 = vpack.c.bf16 %v1776_v43, %v1775_v41 }
0x12fb   :  { %2364 = vmatmul.mubr.msk.bf16.vlgmr.msra.gmra.mxu0 %vm924_vm5, %v1786_v44 }
0x13bb   :  { %v1852_v10 = vpop.f32.mrf.mxu0 }
0x13bc   :  { %v1853_v31 = vadd.f32 %v1852_v10, %v1790_v48 }
0x13bd   :  { %v2365_v49 = vpop.f32.mrf.mxu0 }
0x13be   :  { %v1859_v50 = vadd.f32 %v1853_v31, %v1687_v62 }
0x13bf   :  { %v1855_v42 = vpop.f32.mrf.mxu0 }
0x13c0   :  { %v1856_v37 = vadd.f32 %v1855_v42, %v1790_v48  ;;  %v1861_v15 = vsel %vm46_vm0, %v1859_v50, 0.0 }
0x13c1   :  { %1862 = vadd.xlane.f32.xlu1 %v1861_v15  ;;  %v2366_v51 = vpop.f32.mrf.mxu0 }
0x13c2   :  { %v1860_v38 = vadd.f32 %v1856_v37, %v1688_v0 }
0x13c4   :  { %v1864_v52 = vsel %vm46_vm0, %v1860_v38, 0.0 }
0x13c5   :  { %1865 = vadd.xlane.f32.xlu0 %v1864_v52 }
0x144a   :  { %v1863_v17 = vpop.xlane.xlu1 %1862 }
0x144b   :  { %v1867_v39 = vmul.f32 0.03125, %v1863_v17 }
0x144d   :  { %v1869_v54 = vsub.f32 %v1859_v50, %v1867_v39 }
0x144e   :  { %v1866_v55 = vpop.xlane.xlu0 %1865 }
0x144f   :  { %v1868_v40 = vmul.f32 0.03125, %v1866_v55  ;;  %v1871_v53 = vmul.f32 %v1869_v54, %v1869_v54 }
0x1451   :  { %v1870_v56 = vsub.f32 %v1860_v38, %v1868_v40  ;;  %v1873_v57 = vsel %vm46_vm0, %v1871_v53, 0.0 }
0x1452   :  { %1874 = vadd.xlane.f32.xlu1 %v1873_v57 }
0x1453   :  { %v1872_v58 = vmul.f32 %v1870_v56, %v1870_v56 }
0x1455   :  { %v1876_v59 = vsel %vm46_vm0, %v1872_v58, 0.0 }
0x1456   :  { %1877 = vadd.xlane.f32.xlu0 %v1876_v59 }
0x1463   :  { %1993 = vrot.lane.b32.xlu1 %v2452_v25, %s2543_s27 }
0x1467   :  { %1987 = vrot.lane.b32.xlu1 %v2450_v61, %s2543_s27 }
0x146b   :  { %1989 = vrot.lane.b32.xlu1 %v2453_v29, %s2543_s27 }
0x146c   :  { %1991 = vrot.lane.b32.xlu0 %v2448_v60, %s2543_s27 }
0x14db   :  { %v1875_v32 = vpop.xlane.xlu1 %1874 }
0x14dc   :  { %v1879_v62 = vmul.f32 0.03125, %v1875_v32 }
0x14de   :  { %v1881_v0 = vadd.f32 1e-12, %v1879_v62 }
0x14df   :  { %v1878_v1 = vpop.xlane.xlu0 %1877  ;;  %v1994_v26 = vpop.permute.xlu1 %1993 }
0x14e0   :  { %2510 = vrsqrt.f32 %v1881_v0  ;;  %v1880_v63 = vmul.f32 0.03125, %v1878_v1 }
0x14e2   :  { %v1882_v3 = vadd.f32 1e-12, %v1880_v63 }
0x14e3   :  { %v1988_v23 = vpop.permute.xlu1 %1987  ;;  %v1992_v24 = vpop.permute.xlu0 %1991 }
0x14e4   :  { %2512 = vrsqrt.f32 %v1882_v3  ;;  %v1997_v27 = vsel %vm1995_vm7, %v1992_v24, %v1994_v26 }
0x14e7   :  { %v1990_v28 = vpop.permute.xlu1 %1989 }
0x14e8   :  { %v1996_v30 = vsel %vm1995_vm7, %v1988_v23, %v1990_v28 }
0x14ed   :  { %v2511_v4 = vpop.eup %2510 }
0x14ee   :  { %v1885_v21 = vmul.f32 %v2511_v4, %v1869_v54 }
0x14f0   :  { %v1891_v46 = vmul.f32 %v1890_v2, %v1885_v21 }
0x14f1   :  { %v2513_v5 = vpop.eup %2512 }
0x14f2   :  { %v1886_v7 = vmul.f32 %v2513_v5, %v1870_v56  ;;  %v1897_v9 = vadd.f32 %v2121_v6, %v1891_v46 }
0x14f4   :  { %v1892_v8 = vmul.f32 %v1890_v2, %v1886_v7  ;;  %v1903_v12 = vpack.c.bf16 %v1897_v9, %v1897_v9 }
0x14f6   :  { %v1898_v11 = vadd.f32 %v2121_v6, %v1892_v8  ;;  %v1911_v18 = vunpack.c.l.b16 %v1903_v12 }
0x14f8   :  { %v1904_v13 = vpack.c.bf16 %v1898_v11, %v1898_v11 }
0x14fa   :  { %v1912_v14 = vunpack.c.l.b16 %v1904_v13 }
0x14fc   :  { %v1913_v19 = vrot.slane %v1912_v14, 7 }
0x14fe   :  { %v1915_v22 = vsel %vm1914_vm6, %v1913_v19, %v1911_v18 }
0x14ff   :  { %v1916_v45 = vpack.c.b16 %v1915_v22, %v1915_v22 }
0x1501   :  { %2372 = vmatmul.mubr.msk.bf16.vlgmr.msra.gmra.mxu1 %vm46_vm0, %v1916_v45 }
0x1502   :  { %2379 = vmatprep.mubr.msk.bf16.mxu1 %vm2540_vm1, %v2539_v16  ;;  %2376 = vmatpush3.bf16.msra.mxu1 %v1997_v27 }
0x1503   :  { %2377 = vmatprep.subr.bf16.mxu1 %v2539_v16  ;;  %v2125_v16 = vld [vmem:[%s3055_s9] ss:$0 sm:$0xff] }
0x1506   :  { %2378 = vmatpush3.bf16.msra.mxu1 %v1996_v30 }
0x15c1   :  { %v1966_v34 = vpop.f32.mrf.mxu1 }
0x15c2   :  { %v1967_v35 = vadd.f32 %v1966_v34, %v1908_v20 }
0x15c3   :  { %v2373_v36 = vpop.f32.mrf.mxu1 }
0x15c4   :  { %2514 = vtanh.f32 %v1967_v35 }
0x15c5   :  { %v1969_v41 = vpop.f32.mrf.mxu1 }
0x15c7   :  { %v2374_v43 = vpop.f32.mrf.mxu1 }
0x15d1   :  { %v2515_v44 = vpop.eup %2514 }
0x15d2   :  { %v1973_v48 = vpack.c.bf16 %v2515_v44, %v2515_v44 }
0x15d4   :  { %2380 = vmatmul.mubr.msk.bf16.vlgmr.msra.gmra.mxu1 %vm46_vm0, %v1973_v48 }
0x1694   :  { %v2037_v10 = vpop.f32.mrf.mxu1 }
0x1695   :  { %v2038_v31 = vadd.f32 %v2125_v16, %v2037_v10 }
0x1696   :  { %v2381_v47 = vpop.f32.mrf.mxu1 }
0x1697   :  { %2043 = vst [vmem:[#allocation3] sm:$0x3] %v2038_v31 }
0x1698   :  { %v2040_v49 = vpop.f32.mrf.mxu1 }
0x1699   :  { %2528 = shalt.err (!%p2525_p4)
}
0x169a   :  { %2053 = dma.vmem_to_hbm [thread:$0]  %s2051_s26, 32, %s3057_s11, [#allocation4]   ;;  %v2382_v50 = vpop.f32.mrf.mxu1 }
0x169b   :  { %2537 = dma.done.wait [#allocation4], 32  }
0x169c   :  { %2538 = vsyncadd [#allocation4], 4294967264 }
0x169d   :  { %2057 = vsyncpa [#allocation4], 1 }

</bundles_post_ra>
